<compile_context>
chip_gen: v6e
topology: v6e:2x2x1
jax: 0.10.0
libtpu: 0.0.40
codegen_flags: <defaults>
</compile_context>

<pallas_src>
import numpy as np
import jax
import jax.numpy as jnp
from jax import lax
from jax.experimental import pallas as pl
from jax.experimental.pallas import tpu as pltpu

# ----------------------------- configuration --------------------------------
PATCH = 8          # encoder.patch_size
IN_CH = 3
EMBED = 32         # encoder embedding dim
DEPTH = 2          # number of transformer blocks
HEADS = 4
HEAD_DIM = EMBED // HEADS
MLP_DIM = 4 * EMBED
N_CLS = 16         # small n_cls for the synthetic example (module default 1000)
LN_EPS = 1e-6
DISTILLED = 0      # encoder.distilled -> num_extra_tokens = 1 + 0
ATTN_SCALE = HEAD_DIM ** -0.5


# --------------------------- in-kernel helpers -------------------------------
def _ln(x, g, b):
    """LayerNorm over the last axis (biased variance, like torch)."""
    mu = jnp.mean(x, axis=-1, keepdims=True)
    xc = x - mu
    var = jnp.mean(xc * xc, axis=-1, keepdims=True)
    return xc * lax.rsqrt(var + LN_EPS) * g + b


def _dot(a, b):
    return jnp.dot(a, b, preferred_element_type=jnp.float32)


def _dot_t(a, b):
    """a @ b.T by contracting the last dims (no materialized transpose)."""
    return lax.dot_general(a, b, (((1,), (1,)), ((), ())),
                           preferred_element_type=jnp.float32)


# ------------------------------ fused kernel ---------------------------------
def _segmenter_kernel(patches_ref, pos_ref, pw_ref, pb_ref,
                      ln1g_ref, ln1b_ref, qkvw_ref, qkvb_ref,
                      projw_ref, projb_ref, ln2g_ref, ln2b_ref,
                      fc1w_ref, fc1b_ref, fc2w_ref, fc2b_ref,
                      ng_ref, nb_ref, hwt_ref, hbt_ref, at_ref,
                      o_ref):
    # ---- patch embedding (cls token folded into pos_ref host-side) ----------
    p = patches_ref[0]                                   # (n_tok, C*P*P)
    x = _dot(p, pw_ref[...]) + pb_ref[...] + pos_ref[...]  # (n_tok, E)

    # ---- transformer blocks, fully resident in VMEM/vregs -------------------
    for d in range(DEPTH):
        # --- self attention ---
        h = _ln(x, ln1g_ref[d], ln1b_ref[d])
        qkv = _dot(h, qkvw_ref[d]) + qkvb_ref[d]         # (n_tok, 3E)
        q = qkv[:, 0:EMBED] * ATTN_SCALE                 # scale folded into q
        k = qkv[:, EMBED:2 * EMBED]
        v = qkv[:, 2 * EMBED:3 * EMBED]
        proj_w = projw_ref[d]                            # (E, E)
        acc = x + projb_ref[d]                           # residual + bias folded
        for hd in range(HEADS):
            lo, hi = hd * HEAD_DIM, (hd + 1) * HEAD_DIM
            s = _dot_t(q[:, lo:hi], k[:, lo:hi])         # (n_tok, n_tok)
            s = s - jnp.max(s, axis=-1, keepdims=True)
            e = jnp.exp(s)
            pattn = e * pl.reciprocal(
                jnp.sum(e, axis=-1, keepdims=True), approx=True)
            oh = _dot(pattn, v[:, lo:hi])                # (n_tok, dh)
            acc = acc + _dot(oh, proj_w[lo:hi, :])       # per-head output proj
        x = acc
        # --- MLP ---
        h = _ln(x, ln2g_ref[d], ln2b_ref[d])
        h = _dot(h, fc1w_ref[d]) + fc1b_ref[d]
        # TODO(synk): torch nn.GELU default is exact erf-GELU; tanh approx used
        # here for a guaranteed EUP lowering on TPU (~1e-3 difference).
        h = jax.nn.gelu(h, approximate=True)
        x = x + _dot(h, fc2w_ref[d]) + fc2b_ref[d]       # residual folded

    x = _ln(x, ng_ref[...], nb_ref[...])

    # ---- decoder head + bilinear upsample (one matmul, lane-dense output) ---
    xt = x[1 + DISTILLED:, :]                            # drop extra tokens
    m_t = _dot_t(hwt_ref[...], xt) + hbt_ref[...]        # (n_cls, gh*gw)
    # up[c, i*W+j] = sum_{p,q} mask[c,p,q]*Ah[i,p]*Aw[j,q];  at = kron(Ah,Aw).T
    up = _dot(m_t, at_ref[...])                          # (n_cls, H*W)
    o_ref[0] = up.astype(o_ref.dtype)


# ------------------------------ host glue ------------------------------------
def padding_fn(im, patch_size):
    B, C, H, W = im.shape
    pad_h = (patch_size - H % patch_size) % patch_size
    pad_w = (patch_size - W % patch_size) % patch_size
    if pad_h or pad_w:
        im = jnp.pad(im, ((0, 0), (0, 0), (0, pad_h), (0, pad_w)))
    return im


def _bilinear_matrix(out_size, in_size):
    """Row-stochastic matrix reproducing F.interpolate(bilinear, align_corners=False)."""
    i = np.arange(out_size, dtype=np.float64)
    src = (i + 0.5) * (in_size / out_size) - 0.5
    src = np.maximum(src, 0.0)
    i0f = np.floor(src)
    frac = src - i0f
    i0 = np.minimum(i0f.astype(np.int64), in_size - 1)
    i1 = np.minimum(i0 + 1, in_size - 1)
    A = np.zeros((out_size, in_size), np.float32)
    A[np.arange(out_size), i0] += (1.0 - frac).astype(np.float32)
    A[np.arange(out_size), i1] += frac.astype(np.float32)
    return A


def _const_spec(shape):
    """Full-array block, same block for every grid step (no re-DMA)."""
    zeros = (0,) * len(shape)
    return pl.BlockSpec(tuple(shape), lambda b, _z=zeros: _z)


def segmenter_forward(params, im):
    B, C, H_ori, W_ori = im.shape
    im = padding_fn(im, PATCH)
    H, W = im.shape[2], im.shape[3]
    gh, gw = H // PATCH, W // PATCH
    n_patch = gh * gw
    n_tok = 1 + DISTILLED + n_patch
    cpp = C * PATCH * PATCH

    enc, dec = params["encoder"], params["decoder"]

    # patch unfold (tiny host reshape/transpose).
    # TODO(synk): at real Segmenter sizes, move the unfold into the kernel to
    # avoid one HBM copy of the image.
    patches = im.reshape(B, C, gh, PATCH, gw, PATCH)
    patches = patches.transpose(0, 2, 4, 1, 3, 5).reshape(B, n_patch, cpp)
    # zero "patch" row for the cls token -> token assembly is one matmul
    patches = jnp.concatenate(
        [jnp.zeros((B, 1 + DISTILLED, cpp), patches.dtype), patches], axis=1)
    # fold cls token exactly into the position embedding:
    #   row 0 of x = 0 @ W + b + (pos0 + cls - b) = cls + pos0
    pos_adj = enc["pos_embed"].at[0:1, :].add(enc["cls_token"] - enc["patch_b"])

    # precomputed separable bilinear operator (align_corners=False)
    Ah = _bilinear_matrix(H, gh)                       # (H, gh)
    Aw = _bilinear_matrix(W, gw)                       # (W, gw)
    a_t = jnp.asarray(np.kron(Ah, Aw).T)               # (gh*gw, H*W)

    head_w_t = dec["head_w"].T                         # (n_cls, E)
    head_b_t = dec["head_b"].reshape(N_CLS, 1)         # (n_cls, 1)

    inputs = (patches, pos_adj, enc["patch_w"], enc["patch_b"],
              enc["ln1_g"], enc["ln1_b"], enc["qkv_w"], enc["qkv_b"],
              enc["proj_w"], enc["proj_b"], enc["ln2_g"], enc["ln2_b"],
              enc["fc1_w"], enc["fc1_b"], enc["fc2_w"], enc["fc2_b"],
              enc["norm_g"], enc["norm_b"], head_w_t, head_b_t, a_t)

    in_specs = [pl.BlockSpec((1, n_tok, cpp), lambda b: (b, 0, 0))]
    in_specs += [_const_spec(a.shape) for a in inputs[1:]]

    out = pl.pallas_call(
        _segmenter_kernel,
        out_shape=jax.ShapeDtypeStruct((B, N_CLS, H * W), jnp.float32),
        grid=(B,),
        in_specs=in_specs,
        out_specs=pl.BlockSpec((1, N_CLS, H * W), lambda b: (b, 0, 0)),
        compiler_params=pltpu.CompilerParams(
            dimension_semantics=("parallel",)),    # v7x: shard batches over 2 TCs
    )(*inputs)

    masks = out.reshape(B, N_CLS, H, W)
    return masks[:, :, :H_ori, :W_ori]             # unpadding


# --------------------------- deterministic params ----------------------------
def init_params(key, n_tokens):
    def w(k, shape):
        return jax.random.normal(k, shape, jnp.float32) * 0.02

    keys = jax.random.split(key, 8)
    enc = {
        "patch_w": w(keys[0], (IN_CH * PATCH * PATCH, EMBED)),
        "patch_b": jnp.zeros((1, EMBED), jnp.float32),
        "cls_token": w(keys[1], (1, EMBED)),
        "pos_embed": w(keys[2], (n_tokens, EMBED)),
        "norm_g": jnp.ones((1, EMBED), jnp.float32),
        "norm_b": jnp.zeros((1, EMBED), jnp.float32),
        # per-block params stacked along a DEPTH axis
        "ln1_g": jnp.ones((DEPTH, 1, EMBED), jnp.float32),
        "ln1_b": jnp.zeros((DEPTH, 1, EMBED), jnp.float32),
        "qkv_w": w(keys[3], (DEPTH, EMBED, 3 * EMBED)),
        "qkv_b": jnp.zeros((DEPTH, 1, 3 * EMBED), jnp.float32),
        "proj_w": w(keys[4], (DEPTH, EMBED, EMBED)),
        "proj_b": jnp.zeros((DEPTH, 1, EMBED), jnp.float32),
        "ln2_g": jnp.ones((DEPTH, 1, EMBED), jnp.float32),
        "ln2_b": jnp.zeros((DEPTH, 1, EMBED), jnp.float32),
        "fc1_w": w(keys[5], (DEPTH, EMBED, MLP_DIM)),
        "fc1_b": jnp.zeros((DEPTH, 1, MLP_DIM), jnp.float32),
        "fc2_w": w(keys[6], (DEPTH, MLP_DIM, EMBED)),
        "fc2_b": jnp.zeros((DEPTH, 1, EMBED), jnp.float32),
    }
    dec = {
        "head_w": w(keys[7], (EMBED, N_CLS)),
        "head_b": jnp.zeros((1, N_CLS), jnp.float32),
    }
    return {"encoder": enc, "decoder": dec}


# ----------------------------------- main -------------------------------------
if __name__ == "__main__":
    key = jax.random.PRNGKey(0)
    k_im, k_par = jax.random.split(key)

    B, H_ORI, W_ORI = 2, 14, 14                       # padded to 16x16 by PATCH=8
    im = jax.random.normal(k_im, (B, IN_CH, H_ORI, W_ORI), jnp.float32)

    H_pad = ((H_ORI + PATCH - 1) // PATCH) * PATCH
    W_pad = ((W_ORI + PATCH - 1) // PATCH) * PATCH
    n_tokens = 1 + DISTILLED + (H_pad // PATCH) * (W_pad // PATCH)
    params = init_params(k_par, n_tokens)

    fwd = jax.jit(segmenter_forward)
    out = jax.block_until_ready(fwd(params, im))

    assert out.shape == (B, N_CLS, H_ORI, W_ORI), out.shape
    assert bool(jnp.all(jnp.isfinite(out)))
    print("KERNEL_OK")
</pallas_src>

<mosaic_0001>
module attributes {stable_mosaic.version = 11 : i64} {
  func.func @_segmenter_kernel(%arg0: i32, %arg1: memref<1x5x192xf32, #tpu.memory_space<vmem>>, %arg2: memref<5x32xf32, #tpu.memory_space<vmem>>, %arg3: memref<192x32xf32, #tpu.memory_space<vmem>>, %arg4: memref<1x32xf32, #tpu.memory_space<vmem>>, %arg5: memref<2x1x32xf32, #tpu.memory_space<vmem>>, %arg6: memref<2x1x32xf32, #tpu.memory_space<vmem>>, %arg7: memref<2x32x96xf32, #tpu.memory_space<vmem>>, %arg8: memref<2x1x96xf32, #tpu.memory_space<vmem>>, %arg9: memref<2x32x32xf32, #tpu.memory_space<vmem>>, %arg10: memref<2x1x32xf32, #tpu.memory_space<vmem>>, %arg11: memref<2x1x32xf32, #tpu.memory_space<vmem>>, %arg12: memref<2x1x32xf32, #tpu.memory_space<vmem>>, %arg13: memref<2x32x128xf32, #tpu.memory_space<vmem>>, %arg14: memref<2x1x128xf32, #tpu.memory_space<vmem>>, %arg15: memref<2x128x32xf32, #tpu.memory_space<vmem>>, %arg16: memref<2x1x32xf32, #tpu.memory_space<vmem>>, %arg17: memref<1x32xf32, #tpu.memory_space<vmem>>, %arg18: memref<1x32xf32, #tpu.memory_space<vmem>>, %arg19: memref<16x32xf32, #tpu.memory_space<vmem>>, %arg20: memref<16x1xf32, #tpu.memory_space<vmem>>, %arg21: memref<4x256xf32, #tpu.memory_space<vmem>>, %arg22: memref<1x16x256xf32, #tpu.memory_space<vmem>>) attributes {dimension_semantics = [#tpu.dimension_semantics<parallel>], iteration_bounds = array<i64: 2>, scalar_prefetch = 0 : i64, scratch_operands = 0 : i64, tpu.core_type = #tpu.core_type<tc>, window_params = [{transform_indices = @transform_0, window_bounds = array<i64: 1, 5, 192>}, {pipeline_mode = #tpu.pipeline_mode<synchronous>, transform_indices = @transform_1, window_bounds = array<i64: 5, 32>}, {pipeline_mode = #tpu.pipeline_mode<synchronous>, transform_indices = @transform_2, window_bounds = array<i64: 192, 32>}, {pipeline_mode = #tpu.pipeline_mode<synchronous>, transform_indices = @transform_3, window_bounds = array<i64: 1, 32>}, {pipeline_mode = #tpu.pipeline_mode<synchronous>, transform_indices = @transform_4, window_bounds = array<i64: 2, 1, 32>}, {pipeline_mode = #tpu.pipeline_mode<synchronous>, transform_indices = @transform_5, window_bounds = array<i64: 2, 1, 32>}, {pipeline_mode = #tpu.pipeline_mode<synchronous>, transform_indices = @transform_6, window_bounds = array<i64: 2, 32, 96>}, {pipeline_mode = #tpu.pipeline_mode<synchronous>, transform_indices = @transform_7, window_bounds = array<i64: 2, 1, 96>}, {pipeline_mode = #tpu.pipeline_mode<synchronous>, transform_indices = @transform_8, window_bounds = array<i64: 2, 32, 32>}, {pipeline_mode = #tpu.pipeline_mode<synchronous>, transform_indices = @transform_9, window_bounds = array<i64: 2, 1, 32>}, {pipeline_mode = #tpu.pipeline_mode<synchronous>, transform_indices = @transform_10, window_bounds = array<i64: 2, 1, 32>}, {pipeline_mode = #tpu.pipeline_mode<synchronous>, transform_indices = @transform_11, window_bounds = array<i64: 2, 1, 32>}, {pipeline_mode = #tpu.pipeline_mode<synchronous>, transform_indices = @transform_12, window_bounds = array<i64: 2, 32, 128>}, {pipeline_mode = #tpu.pipeline_mode<synchronous>, transform_indices = @transform_13, window_bounds = array<i64: 2, 1, 128>}, {pipeline_mode = #tpu.pipeline_mode<synchronous>, transform_indices = @transform_14, window_bounds = array<i64: 2, 128, 32>}, {pipeline_mode = #tpu.pipeline_mode<synchronous>, transform_indices = @transform_15, window_bounds = array<i64: 2, 1, 32>}, {pipeline_mode = #tpu.pipeline_mode<synchronous>, transform_indices = @transform_16, window_bounds = array<i64: 1, 32>}, {pipeline_mode = #tpu.pipeline_mode<synchronous>, transform_indices = @transform_17, window_bounds = array<i64: 1, 32>}, {pipeline_mode = #tpu.pipeline_mode<synchronous>, transform_indices = @transform_18, window_bounds = array<i64: 16, 32>}, {pipeline_mode = #tpu.pipeline_mode<synchronous>, transform_indices = @transform_19, window_bounds = array<i64: 16, 1>}, {pipeline_mode = #tpu.pipeline_mode<synchronous>, transform_indices = @transform_20, window_bounds = array<i64: 4, 256>}, {transform_indices = @transform_21, window_bounds = array<i64: 1, 16, 256>}]} {
    %c0 = arith.constant 0 : index
    %c0_0 = arith.constant 0 : index
    %c0_1 = arith.constant 0 : index
    %0 = vector.load %arg1[%c0, %c0_0, %c0_1] : memref<1x5x192xf32, #tpu.memory_space<vmem>>, vector<1x5x192xf32>
    %1 = vector.shape_cast %0 : vector<1x5x192xf32> to vector<5x192xf32>
    %c0_2 = arith.constant 0 : index
    %c0_3 = arith.constant 0 : index
    %2 = vector.load %arg3[%c0_2, %c0_3] : memref<192x32xf32, #tpu.memory_space<vmem>>, vector<192x32xf32>
    %cst = arith.constant dense<0.000000e+00> : vector<5x32xf32>
    %3 = tpu.matmul %1, %2, %cst {dimension_numbers = #tpu.dot_dimension_numbers<[1], [0], [0], [1], [0, 0, 1, 1], [], []>} : vector<5x192xf32>, vector<192x32xf32>, vector<5x32xf32> -> vector<5x32xf32>
    %c0_4 = arith.constant 0 : index
    %c0_5 = arith.constant 0 : index
    %4 = vector.load %arg4[%c0_4, %c0_5] : memref<1x32xf32, #tpu.memory_space<vmem>>, vector<1x32xf32>
    %5 = vector.broadcast %4 : vector<1x32xf32> to vector<5x32xf32>
    %6 = arith.addf %3, %5 : vector<5x32xf32>
    %c0_6 = arith.constant 0 : index
    %c0_7 = arith.constant 0 : index
    %7 = vector.load %arg2[%c0_6, %c0_7] : memref<5x32xf32, #tpu.memory_space<vmem>>, vector<5x32xf32>
    %8 = arith.addf %6, %7 : vector<5x32xf32>
    %c0_8 = arith.constant 0 : index
    %c0_9 = arith.constant 0 : index
    %c0_10 = arith.constant 0 : index
    %9 = vector.load %arg5[%c0_8, %c0_9, %c0_10] : memref<2x1x32xf32, #tpu.memory_space<vmem>>, vector<1x1x32xf32>
    %10 = vector.shape_cast %9 : vector<1x1x32xf32> to vector<1x32xf32>
    %c0_11 = arith.constant 0 : index
    %c0_12 = arith.constant 0 : index
    %c0_13 = arith.constant 0 : index
    %11 = vector.load %arg6[%c0_11, %c0_12, %c0_13] : memref<2x1x32xf32, #tpu.memory_space<vmem>>, vector<1x1x32xf32>
    %12 = vector.shape_cast %11 : vector<1x1x32xf32> to vector<1x32xf32>
    %cst_14 = arith.constant dense<0.000000e+00> : vector<5xf32>
    %13 = vector.multi_reduction <add>, %8, %cst_14 [1] : vector<5x32xf32> to vector<5xf32>
    %14 = vector.shape_cast %13 : vector<5xf32> to vector<5x1xf32>
    %cst_15 = arith.constant 3.200000e+01 : f32
    %15 = vector.broadcast %cst_15 : f32 to vector<5x1xf32>
    %16 = arith.divf %14, %15 : vector<5x1xf32>
    %17 = vector.broadcast %16 : vector<5x1xf32> to vector<5x32xf32>
    %18 = arith.subf %8, %17 : vector<5x32xf32>
    %19 = arith.mulf %18, %18 : vector<5x32xf32>
    %cst_16 = arith.constant dense<0.000000e+00> : vector<5xf32>
    %20 = vector.multi_reduction <add>, %19, %cst_16 [1] : vector<5x32xf32> to vector<5xf32>
    %21 = vector.shape_cast %20 : vector<5xf32> to vector<5x1xf32>
    %cst_17 = arith.constant 3.200000e+01 : f32
    %22 = vector.broadcast %cst_17 : f32 to vector<5x1xf32>
    %23 = arith.divf %21, %22 : vector<5x1xf32>
    %cst_18 = arith.constant 9.99999997E-7 : f32
    %24 = vector.broadcast %cst_18 : f32 to vector<5x1xf32>
    %25 = arith.addf %23, %24 : vector<5x1xf32>
    %26 = math.rsqrt %25 : vector<5x1xf32>
    %27 = vector.broadcast %26 : vector<5x1xf32> to vector<5x32xf32>
    %28 = arith.mulf %18, %27 : vector<5x32xf32>
    %29 = vector.broadcast %10 : vector<1x32xf32> to vector<5x32xf32>
    %30 = arith.mulf %28, %29 : vector<5x32xf32>
    %31 = vector.broadcast %12 : vector<1x32xf32> to vector<5x32xf32>
    %32 = arith.addf %30, %31 : vector<5x32xf32>
    %c0_19 = arith.constant 0 : index
    %c0_20 = arith.constant 0 : index
    %c0_21 = arith.constant 0 : index
    %33 = vector.load %arg7[%c0_19, %c0_20, %c0_21] : memref<2x32x96xf32, #tpu.memory_space<vmem>>, vector<1x32x96xf32>
    %34 = vector.shape_cast %33 : vector<1x32x96xf32> to vector<32x96xf32>
    %cst_22 = arith.constant dense<0.000000e+00> : vector<5x96xf32>
    %35 = tpu.matmul %32, %34, %cst_22 {dimension_numbers = #tpu.dot_dimension_numbers<[1], [0], [0], [1], [0, 0, 1, 1], [], []>} : vector<5x32xf32>, vector<32x96xf32>, vector<5x96xf32> -> vector<5x96xf32>
    %c0_23 = arith.constant 0 : index
    %c0_24 = arith.constant 0 : index
    %c0_25 = arith.constant 0 : index
    %36 = vector.load %arg8[%c0_23, %c0_24, %c0_25] : memref<2x1x96xf32, #tpu.memory_space<vmem>>, vector<1x1x96xf32>
    %37 = vector.shape_cast %36 : vector<1x1x96xf32> to vector<1x96xf32>
    %38 = vector.broadcast %37 : vector<1x96xf32> to vector<5x96xf32>
    %39 = arith.addf %35, %38 : vector<5x96xf32>
    %40 = vector.extract_strided_slice %39 {offsets = [0, 0], sizes = [5, 32], strides = [1, 1]} : vector<5x96xf32> to vector<5x32xf32>
    %cst_26 = arith.constant 0.353553385 : f32
    %41 = vector.broadcast %cst_26 : f32 to vector<5x32xf32>
    %42 = arith.mulf %40, %41 : vector<5x32xf32>
    %43 = vector.extract_strided_slice %39 {offsets = [0, 32], sizes = [5, 32], strides = [1, 1]} : vector<5x96xf32> to vector<5x32xf32>
    %44 = vector.extract_strided_slice %39 {offsets = [0, 64], sizes = [5, 32], strides = [1, 1]} : vector<5x96xf32> to vector<5x32xf32>
    %c0_27 = arith.constant 0 : index
    %c0_28 = arith.constant 0 : index
    %c0_29 = arith.constant 0 : index
    %45 = vector.load %arg9[%c0_27, %c0_28, %c0_29] : memref<2x32x32xf32, #tpu.memory_space<vmem>>, vector<1x32x32xf32>
    %46 = vector.shape_cast %45 : vector<1x32x32xf32> to vector<32x32xf32>
    %c0_30 = arith.constant 0 : index
    %c0_31 = arith.constant 0 : index
    %c0_32 = arith.constant 0 : index
    %47 = vector.load %arg10[%c0_30, %c0_31, %c0_32] : memref<2x1x32xf32, #tpu.memory_space<vmem>>, vector<1x1x32xf32>
    %48 = vector.shape_cast %47 : vector<1x1x32xf32> to vector<1x32xf32>
    %49 = vector.broadcast %48 : vector<1x32xf32> to vector<5x32xf32>
    %50 = arith.addf %8, %49 : vector<5x32xf32>
    %51 = vector.extract_strided_slice %42 {offsets = [0, 0], sizes = [5, 8], strides = [1, 1]} : vector<5x32xf32> to vector<5x8xf32>
    %52 = vector.extract_strided_slice %43 {offsets = [0, 0], sizes = [5, 8], strides = [1, 1]} : vector<5x32xf32> to vector<5x8xf32>
    %cst_33 = arith.constant dense<0.000000e+00> : vector<5x5xf32>
    %53 = tpu.matmul %51, %52, %cst_33 {dimension_numbers = #tpu.dot_dimension_numbers<[1], [1], [0], [0], [0, 0, 1, 0], [], []>} : vector<5x8xf32>, vector<5x8xf32>, vector<5x5xf32> -> vector<5x5xf32>
    %cst_34 = arith.constant dense<0xFF800000> : vector<5xf32>
    %54 = vector.multi_reduction <maximumf>, %53, %cst_34 [1] : vector<5x5xf32> to vector<5xf32>
    %55 = vector.shape_cast %54 : vector<5xf32> to vector<5x1xf32>
    %56 = vector.broadcast %55 : vector<5x1xf32> to vector<5x5xf32>
    %57 = arith.subf %53, %56 : vector<5x5xf32>
    %58 = math.exp %57 : vector<5x5xf32>
    %cst_35 = arith.constant dense<0.000000e+00> : vector<5xf32>
    %59 = vector.multi_reduction <add>, %58, %cst_35 [1] : vector<5x5xf32> to vector<5xf32>
    %60 = vector.shape_cast %59 : vector<5xf32> to vector<5x1xf32>
    %61 = tpu.reciprocal %60 {approx = true} : vector<5x1xf32> -> vector<5x1xf32>
    %62 = vector.broadcast %61 : vector<5x1xf32> to vector<5x5xf32>
    %63 = arith.mulf %58, %62 : vector<5x5xf32>
    %64 = vector.extract_strided_slice %44 {offsets = [0, 0], sizes = [5, 8], strides = [1, 1]} : vector<5x32xf32> to vector<5x8xf32>
    %cst_36 = arith.constant dense<0.000000e+00> : vector<5x8xf32>
    %65 = tpu.matmul %63, %64, %cst_36 {dimension_numbers = #tpu.dot_dimension_numbers<[1], [0], [0], [1], [0, 0, 1, 1], [], []>} : vector<5x5xf32>, vector<5x8xf32>, vector<5x8xf32> -> vector<5x8xf32>
    %66 = vector.extract_strided_slice %46 {offsets = [0, 0], sizes = [8, 32], strides = [1, 1]} : vector<32x32xf32> to vector<8x32xf32>
    %cst_37 = arith.constant dense<0.000000e+00> : vector<5x32xf32>
    %67 = tpu.matmul %65, %66, %cst_37 {dimension_numbers = #tpu.dot_dimension_numbers<[1], [0], [0], [1], [0, 0, 1, 1], [], []>} : vector<5x8xf32>, vector<8x32xf32>, vector<5x32xf32> -> vector<5x32xf32>
    %68 = arith.addf %50, %67 : vector<5x32xf32>
    %69 = vector.extract_strided_slice %42 {offsets = [0, 8], sizes = [5, 8], strides = [1, 1]} : vector<5x32xf32> to vector<5x8xf32>
    %70 = vector.extract_strided_slice %43 {offsets = [0, 8], sizes = [5, 8], strides = [1, 1]} : vector<5x32xf32> to vector<5x8xf32>
    %cst_38 = arith.constant dense<0.000000e+00> : vector<5x5xf32>
    %71 = tpu.matmul %69, %70, %cst_38 {dimension_numbers = #tpu.dot_dimension_numbers<[1], [1], [0], [0], [0, 0, 1, 0], [], []>} : vector<5x8xf32>, vector<5x8xf32>, vector<5x5xf32> -> vector<5x5xf32>
    %cst_39 = arith.constant dense<0xFF800000> : vector<5xf32>
    %72 = vector.multi_reduction <maximumf>, %71, %cst_39 [1] : vector<5x5xf32> to vector<5xf32>
    %73 = vector.shape_cast %72 : vector<5xf32> to vector<5x1xf32>
    %74 = vector.broadcast %73 : vector<5x1xf32> to vector<5x5xf32>
    %75 = arith.subf %71, %74 : vector<5x5xf32>
    %76 = math.exp %75 : vector<5x5xf32>
    %cst_40 = arith.constant dense<0.000000e+00> : vector<5xf32>
    %77 = vector.multi_reduction <add>, %76, %cst_40 [1] : vector<5x5xf32> to vector<5xf32>
    %78 = vector.shape_cast %77 : vector<5xf32> to vector<5x1xf32>
    %79 = tpu.reciprocal %78 {approx = true} : vector<5x1xf32> -> vector<5x1xf32>
    %80 = vector.broadcast %79 : vector<5x1xf32> to vector<5x5xf32>
    %81 = arith.mulf %76, %80 : vector<5x5xf32>
    %82 = vector.extract_strided_slice %44 {offsets = [0, 8], sizes = [5, 8], strides = [1, 1]} : vector<5x32xf32> to vector<5x8xf32>
    %cst_41 = arith.constant dense<0.000000e+00> : vector<5x8xf32>
    %83 = tpu.matmul %81, %82, %cst_41 {dimension_numbers = #tpu.dot_dimension_numbers<[1], [0], [0], [1], [0, 0, 1, 1], [], []>} : vector<5x5xf32>, vector<5x8xf32>, vector<5x8xf32> -> vector<5x8xf32>
    %84 = vector.extract_strided_slice %46 {offsets = [8, 0], sizes = [8, 32], strides = [1, 1]} : vector<32x32xf32> to vector<8x32xf32>
    %cst_42 = arith.constant dense<0.000000e+00> : vector<5x32xf32>
    %85 = tpu.matmul %83, %84, %cst_42 {dimension_numbers = #tpu.dot_dimension_numbers<[1], [0], [0], [1], [0, 0, 1, 1], [], []>} : vector<5x8xf32>, vector<8x32xf32>, vector<5x32xf32> -> vector<5x32xf32>
    %86 = arith.addf %68, %85 : vector<5x32xf32>
    %87 = vector.extract_strided_slice %42 {offsets = [0, 16], sizes = [5, 8], strides = [1, 1]} : vector<5x32xf32> to vector<5x8xf32>
    %88 = vector.extract_strided_slice %43 {offsets = [0, 16], sizes = [5, 8], strides = [1, 1]} : vector<5x32xf32> to vector<5x8xf32>
    %cst_43 = arith.constant dense<0.000000e+00> : vector<5x5xf32>
    %89 = tpu.matmul %87, %88, %cst_43 {dimension_numbers = #tpu.dot_dimension_numbers<[1], [1], [0], [0], [0, 0, 1, 0], [], []>} : vector<5x8xf32>, vector<5x8xf32>, vector<5x5xf32> -> vector<5x5xf32>
    %cst_44 = arith.constant dense<0xFF800000> : vector<5xf32>
    %90 = vector.multi_reduction <maximumf>, %89, %cst_44 [1] : vector<5x5xf32> to vector<5xf32>
    %91 = vector.shape_cast %90 : vector<5xf32> to vector<5x1xf32>
    %92 = vector.broadcast %91 : vector<5x1xf32> to vector<5x5xf32>
    %93 = arith.subf %89, %92 : vector<5x5xf32>
    %94 = math.exp %93 : vector<5x5xf32>
    %cst_45 = arith.constant dense<0.000000e+00> : vector<5xf32>
    %95 = vector.multi_reduction <add>, %94, %cst_45 [1] : vector<5x5xf32> to vector<5xf32>
    %96 = vector.shape_cast %95 : vector<5xf32> to vector<5x1xf32>
    %97 = tpu.reciprocal %96 {approx = true} : vector<5x1xf32> -> vector<5x1xf32>
    %98 = vector.broadcast %97 : vector<5x1xf32> to vector<5x5xf32>
    %99 = arith.mulf %94, %98 : vector<5x5xf32>
    %100 = vector.extract_strided_slice %44 {offsets = [0, 16], sizes = [5, 8], strides = [1, 1]} : vector<5x32xf32> to vector<5x8xf32>
    %cst_46 = arith.constant dense<0.000000e+00> : vector<5x8xf32>
    %101 = tpu.matmul %99, %100, %cst_46 {dimension_numbers = #tpu.dot_dimension_numbers<[1], [0], [0], [1], [0, 0, 1, 1], [], []>} : vector<5x5xf32>, vector<5x8xf32>, vector<5x8xf32> -> vector<5x8xf32>
    %102 = vector.extract_strided_slice %46 {offsets = [16, 0], sizes = [8, 32], strides = [1, 1]} : vector<32x32xf32> to vector<8x32xf32>
    %cst_47 = arith.constant dense<0.000000e+00> : vector<5x32xf32>
    %103 = tpu.matmul %101, %102, %cst_47 {dimension_numbers = #tpu.dot_dimension_numbers<[1], [0], [0], [1], [0, 0, 1, 1], [], []>} : vector<5x8xf32>, vector<8x32xf32>, vector<5x32xf32> -> vector<5x32xf32>
    %104 = arith.addf %86, %103 : vector<5x32xf32>
    %105 = vector.extract_strided_slice %42 {offsets = [0, 24], sizes = [5, 8], strides = [1, 1]} : vector<5x32xf32> to vector<5x8xf32>
    %106 = vector.extract_strided_slice %43 {offsets = [0, 24], sizes = [5, 8], strides = [1, 1]} : vector<5x32xf32> to vector<5x8xf32>
    %cst_48 = arith.constant dense<0.000000e+00> : vector<5x5xf32>
    %107 = tpu.matmul %105, %106, %cst_48 {dimension_numbers = #tpu.dot_dimension_numbers<[1], [1], [0], [0], [0, 0, 1, 0], [], []>} : vector<5x8xf32>, vector<5x8xf32>, vector<5x5xf32> -> vector<5x5xf32>
    %cst_49 = arith.constant dense<0xFF800000> : vector<5xf32>
    %108 = vector.multi_reduction <maximumf>, %107, %cst_49 [1] : vector<5x5xf32> to vector<5xf32>
    %109 = vector.shape_cast %108 : vector<5xf32> to vector<5x1xf32>
    %110 = vector.broadcast %109 : vector<5x1xf32> to vector<5x5xf32>
    %111 = arith.subf %107, %110 : vector<5x5xf32>
    %112 = math.exp %111 : vector<5x5xf32>
    %cst_50 = arith.constant dense<0.000000e+00> : vector<5xf32>
    %113 = vector.multi_reduction <add>, %112, %cst_50 [1] : vector<5x5xf32> to vector<5xf32>
    %114 = vector.shape_cast %113 : vector<5xf32> to vector<5x1xf32>
    %115 = tpu.reciprocal %114 {approx = true} : vector<5x1xf32> -> vector<5x1xf32>
    %116 = vector.broadcast %115 : vector<5x1xf32> to vector<5x5xf32>
    %117 = arith.mulf %112, %116 : vector<5x5xf32>
    %118 = vector.extract_strided_slice %44 {offsets = [0, 24], sizes = [5, 8], strides = [1, 1]} : vector<5x32xf32> to vector<5x8xf32>
    %cst_51 = arith.constant dense<0.000000e+00> : vector<5x8xf32>
    %119 = tpu.matmul %117, %118, %cst_51 {dimension_numbers = #tpu.dot_dimension_numbers<[1], [0], [0], [1], [0, 0, 1, 1], [], []>} : vector<5x5xf32>, vector<5x8xf32>, vector<5x8xf32> -> vector<5x8xf32>
    %120 = vector.extract_strided_slice %46 {offsets = [24, 0], sizes = [8, 32], strides = [1, 1]} : vector<32x32xf32> to vector<8x32xf32>
    %cst_52 = arith.constant dense<0.000000e+00> : vector<5x32xf32>
    %121 = tpu.matmul %119, %120, %cst_52 {dimension_numbers = #tpu.dot_dimension_numbers<[1], [0], [0], [1], [0, 0, 1, 1], [], []>} : vector<5x8xf32>, vector<8x32xf32>, vector<5x32xf32> -> vector<5x32xf32>
    %122 = arith.addf %104, %121 : vector<5x32xf32>
    %c0_53 = arith.constant 0 : index
    %c0_54 = arith.constant 0 : index
    %c0_55 = arith.constant 0 : index
    %123 = vector.load %arg11[%c0_53, %c0_54, %c0_55] : memref<2x1x32xf32, #tpu.memory_space<vmem>>, vector<1x1x32xf32>
    %124 = vector.shape_cast %123 : vector<1x1x32xf32> to vector<1x32xf32>
    %c0_56 = arith.constant 0 : index
    %c0_57 = arith.constant 0 : index
    %c0_58 = arith.constant 0 : index
    %125 = vector.load %arg12[%c0_56, %c0_57, %c0_58] : memref<2x1x32xf32, #tpu.memory_space<vmem>>, vector<1x1x32xf32>
    %126 = vector.shape_cast %125 : vector<1x1x32xf32> to vector<1x32xf32>
    %cst_59 = arith.constant dense<0.000000e+00> : vector<5xf32>
    %127 = vector.multi_reduction <add>, %122, %cst_59 [1] : vector<5x32xf32> to vector<5xf32>
    %128 = vector.shape_cast %127 : vector<5xf32> to vector<5x1xf32>
    %cst_60 = arith.constant 3.200000e+01 : f32
    %129 = vector.broadcast %cst_60 : f32 to vector<5x1xf32>
    %130 = arith.divf %128, %129 : vector<5x1xf32>
    %131 = vector.broadcast %130 : vector<5x1xf32> to vector<5x32xf32>
    %132 = arith.subf %122, %131 : vector<5x32xf32>
    %133 = arith.mulf %132, %132 : vector<5x32xf32>
    %cst_61 = arith.constant dense<0.000000e+00> : vector<5xf32>
    %134 = vector.multi_reduction <add>, %133, %cst_61 [1] : vector<5x32xf32> to vector<5xf32>
    %135 = vector.shape_cast %134 : vector<5xf32> to vector<5x1xf32>
    %cst_62 = arith.constant 3.200000e+01 : f32
    %136 = vector.broadcast %cst_62 : f32 to vector<5x1xf32>
    %137 = arith.divf %135, %136 : vector<5x1xf32>
    %cst_63 = arith.constant 9.99999997E-7 : f32
    %138 = vector.broadcast %cst_63 : f32 to vector<5x1xf32>
    %139 = arith.addf %137, %138 : vector<5x1xf32>
    %140 = math.rsqrt %139 : vector<5x1xf32>
    %141 = vector.broadcast %140 : vector<5x1xf32> to vector<5x32xf32>
    %142 = arith.mulf %132, %141 : vector<5x32xf32>
    %143 = vector.broadcast %124 : vector<1x32xf32> to vector<5x32xf32>
    %144 = arith.mulf %142, %143 : vector<5x32xf32>
    %145 = vector.broadcast %126 : vector<1x32xf32> to vector<5x32xf32>
    %146 = arith.addf %144, %145 : vector<5x32xf32>
    %c0_64 = arith.constant 0 : index
    %c0_65 = arith.constant 0 : index
    %c0_66 = arith.constant 0 : index
    %147 = vector.load %arg13[%c0_64, %c0_65, %c0_66] : memref<2x32x128xf32, #tpu.memory_space<vmem>>, vector<1x32x128xf32>
    %148 = vector.shape_cast %147 : vector<1x32x128xf32> to vector<32x128xf32>
    %cst_67 = arith.constant dense<0.000000e+00> : vector<5x128xf32>
    %149 = tpu.matmul %146, %148, %cst_67 {dimension_numbers = #tpu.dot_dimension_numbers<[1], [0], [0], [1], [0, 0, 1, 1], [], []>} : vector<5x32xf32>, vector<32x128xf32>, vector<5x128xf32> -> vector<5x128xf32>
    %c0_68 = arith.constant 0 : index
    %c0_69 = arith.constant 0 : index
    %c0_70 = arith.constant 0 : index
    %150 = vector.load %arg14[%c0_68, %c0_69, %c0_70] : memref<2x1x128xf32, #tpu.memory_space<vmem>>, vector<1x1x128xf32>
    %151 = vector.shape_cast %150 : vector<1x1x128xf32> to vector<1x128xf32>
    %152 = vector.broadcast %151 : vector<1x128xf32> to vector<5x128xf32>
    %153 = arith.addf %149, %152 : vector<5x128xf32>
    %154 = arith.mulf %153, %153 : vector<5x128xf32>
    %155 = arith.mulf %153, %154 : vector<5x128xf32>
    %cst_71 = arith.constant 4.471500e-02 : f32
    %156 = vector.broadcast %cst_71 : f32 to vector<5x128xf32>
    %157 = arith.mulf %156, %155 : vector<5x128xf32>
    %158 = arith.addf %153, %157 : vector<5x128xf32>
    %cst_72 = arith.constant 0.797884583 : f32
    %159 = vector.broadcast %cst_72 : f32 to vector<5x128xf32>
    %160 = arith.mulf %159, %158 : vector<5x128xf32>
    %161 = math.tanh %160 : vector<5x128xf32>
    %cst_73 = arith.constant 1.000000e+00 : f32
    %162 = vector.broadcast %cst_73 : f32 to vector<5x128xf32>
    %163 = arith.addf %162, %161 : vector<5x128xf32>
    %cst_74 = arith.constant 5.000000e-01 : f32
    %164 = vector.broadcast %cst_74 : f32 to vector<5x128xf32>
    %165 = arith.mulf %164, %163 : vector<5x128xf32>
    %166 = arith.mulf %153, %165 : vector<5x128xf32>
    %c0_75 = arith.constant 0 : index
    %c0_76 = arith.constant 0 : index
    %c0_77 = arith.constant 0 : index
    %167 = vector.load %arg15[%c0_75, %c0_76, %c0_77] : memref<2x128x32xf32, #tpu.memory_space<vmem>>, vector<1x128x32xf32>
    %168 = vector.shape_cast %167 : vector<1x128x32xf32> to vector<128x32xf32>
    %cst_78 = arith.constant dense<0.000000e+00> : vector<5x32xf32>
    %169 = tpu.matmul %166, %168, %cst_78 {dimension_numbers = #tpu.dot_dimension_numbers<[1], [0], [0], [1], [0, 0, 1, 1], [], []>} : vector<5x128xf32>, vector<128x32xf32>, vector<5x32xf32> -> vector<5x32xf32>
    %170 = arith.addf %122, %169 : vector<5x32xf32>
    %c0_79 = arith.constant 0 : index
    %c0_80 = arith.constant 0 : index
    %c0_81 = arith.constant 0 : index
    %171 = vector.load %arg16[%c0_79, %c0_80, %c0_81] : memref<2x1x32xf32, #tpu.memory_space<vmem>>, vector<1x1x32xf32>
    %172 = vector.shape_cast %171 : vector<1x1x32xf32> to vector<1x32xf32>
    %173 = vector.broadcast %172 : vector<1x32xf32> to vector<5x32xf32>
    %174 = arith.addf %170, %173 : vector<5x32xf32>
    %c1 = arith.constant 1 : index
    %c0_82 = arith.constant 0 : index
    %c0_83 = arith.constant 0 : index
    %175 = vector.load %arg5[%c1, %c0_82, %c0_83] : memref<2x1x32xf32, #tpu.memory_space<vmem>>, vector<1x1x32xf32>
    %176 = vector.shape_cast %175 : vector<1x1x32xf32> to vector<1x32xf32>
    %c1_84 = arith.constant 1 : index
    %c0_85 = arith.constant 0 : index
    %c0_86 = arith.constant 0 : index
    %177 = vector.load %arg6[%c1_84, %c0_85, %c0_86] : memref<2x1x32xf32, #tpu.memory_space<vmem>>, vector<1x1x32xf32>
    %178 = vector.shape_cast %177 : vector<1x1x32xf32> to vector<1x32xf32>
    %cst_87 = arith.constant dense<0.000000e+00> : vector<5xf32>
    %179 = vector.multi_reduction <add>, %174, %cst_87 [1] : vector<5x32xf32> to vector<5xf32>
    %180 = vector.shape_cast %179 : vector<5xf32> to vector<5x1xf32>
    %cst_88 = arith.constant 3.200000e+01 : f32
    %181 = vector.broadcast %cst_88 : f32 to vector<5x1xf32>
    %182 = arith.divf %180, %181 : vector<5x1xf32>
    %183 = vector.broadcast %182 : vector<5x1xf32> to vector<5x32xf32>
    %184 = arith.subf %174, %183 : vector<5x32xf32>
    %185 = arith.mulf %184, %184 : vector<5x32xf32>
    %cst_89 = arith.constant dense<0.000000e+00> : vector<5xf32>
    %186 = vector.multi_reduction <add>, %185, %cst_89 [1] : vector<5x32xf32> to vector<5xf32>
    %187 = vector.shape_cast %186 : vector<5xf32> to vector<5x1xf32>
    %cst_90 = arith.constant 3.200000e+01 : f32
    %188 = vector.broadcast %cst_90 : f32 to vector<5x1xf32>
    %189 = arith.divf %187, %188 : vector<5x1xf32>
    %cst_91 = arith.constant 9.99999997E-7 : f32
    %190 = vector.broadcast %cst_91 : f32 to vector<5x1xf32>
    %191 = arith.addf %189, %190 : vector<5x1xf32>
    %192 = math.rsqrt %191 : vector<5x1xf32>
    %193 = vector.broadcast %192 : vector<5x1xf32> to vector<5x32xf32>
    %194 = arith.mulf %184, %193 : vector<5x32xf32>
    %195 = vector.broadcast %176 : vector<1x32xf32> to vector<5x32xf32>
    %196 = arith.mulf %194, %195 : vector<5x32xf32>
    %197 = vector.broadcast %178 : vector<1x32xf32> to vector<5x32xf32>
    %198 = arith.addf %196, %197 : vector<5x32xf32>
    %c1_92 = arith.constant 1 : index
    %c0_93 = arith.constant 0 : index
    %c0_94 = arith.constant 0 : index
    %199 = vector.load %arg7[%c1_92, %c0_93, %c0_94] : memref<2x32x96xf32, #tpu.memory_space<vmem>>, vector<1x32x96xf32>
    %200 = vector.shape_cast %199 : vector<1x32x96xf32> to vector<32x96xf32>
    %cst_95 = arith.constant dense<0.000000e+00> : vector<5x96xf32>
    %201 = tpu.matmul %198, %200, %cst_95 {dimension_numbers = #tpu.dot_dimension_numbers<[1], [0], [0], [1], [0, 0, 1, 1], [], []>} : vector<5x32xf32>, vector<32x96xf32>, vector<5x96xf32> -> vector<5x96xf32>
    %c1_96 = arith.constant 1 : index
    %c0_97 = arith.constant 0 : index
    %c0_98 = arith.constant 0 : index
    %202 = vector.load %arg8[%c1_96, %c0_97, %c0_98] : memref<2x1x96xf32, #tpu.memory_space<vmem>>, vector<1x1x96xf32>
    %203 = vector.shape_cast %202 : vector<1x1x96xf32> to vector<1x96xf32>
    %204 = vector.broadcast %203 : vector<1x96xf32> to vector<5x96xf32>
    %205 = arith.addf %201, %204 : vector<5x96xf32>
    %206 = vector.extract_strided_slice %205 {offsets = [0, 0], sizes = [5, 32], strides = [1, 1]} : vector<5x96xf32> to vector<5x32xf32>
    %cst_99 = arith.constant 0.353553385 : f32
    %207 = vector.broadcast %cst_99 : f32 to vector<5x32xf32>
    %208 = arith.mulf %206, %207 : vector<5x32xf32>
    %209 = vector.extract_strided_slice %205 {offsets = [0, 32], sizes = [5, 32], strides = [1, 1]} : vector<5x96xf32> to vector<5x32xf32>
    %210 = vector.extract_strided_slice %205 {offsets = [0, 64], sizes = [5, 32], strides = [1, 1]} : vector<5x96xf32> to vector<5x32xf32>
    %c1_100 = arith.constant 1 : index
    %c0_101 = arith.constant 0 : index
    %c0_102 = arith.constant 0 : index
    %211 = vector.load %arg9[%c1_100, %c0_101, %c0_102] : memref<2x32x32xf32, #tpu.memory_space<vmem>>, vector<1x32x32xf32>
    %212 = vector.shape_cast %211 : vector<1x32x32xf32> to vector<32x32xf32>
    %c1_103 = arith.constant 1 : index
    %c0_104 = arith.constant 0 : index
    %c0_105 = arith.constant 0 : index
    %213 = vector.load %arg10[%c1_103, %c0_104, %c0_105] : memref<2x1x32xf32, #tpu.memory_space<vmem>>, vector<1x1x32xf32>
    %214 = vector.shape_cast %213 : vector<1x1x32xf32> to vector<1x32xf32>
    %215 = vector.broadcast %214 : vector<1x32xf32> to vector<5x32xf32>
    %216 = arith.addf %174, %215 : vector<5x32xf32>
    %217 = vector.extract_strided_slice %208 {offsets = [0, 0], sizes = [5, 8], strides = [1, 1]} : vector<5x32xf32> to vector<5x8xf32>
    %218 = vector.extract_strided_slice %209 {offsets = [0, 0], sizes = [5, 8], strides = [1, 1]} : vector<5x32xf32> to vector<5x8xf32>
    %cst_106 = arith.constant dense<0.000000e+00> : vector<5x5xf32>
    %219 = tpu.matmul %217, %218, %cst_106 {dimension_numbers = #tpu.dot_dimension_numbers<[1], [1], [0], [0], [0, 0, 1, 0], [], []>} : vector<5x8xf32>, vector<5x8xf32>, vector<5x5xf32> -> vector<5x5xf32>
    %cst_107 = arith.constant dense<0xFF800000> : vector<5xf32>
    %220 = vector.multi_reduction <maximumf>, %219, %cst_107 [1] : vector<5x5xf32> to vector<5xf32>
    %221 = vector.shape_cast %220 : vector<5xf32> to vector<5x1xf32>
    %222 = vector.broadcast %221 : vector<5x1xf32> to vector<5x5xf32>
    %223 = arith.subf %219, %222 : vector<5x5xf32>
    %224 = math.exp %223 : vector<5x5xf32>
    %cst_108 = arith.constant dense<0.000000e+00> : vector<5xf32>
    %225 = vector.multi_reduction <add>, %224, %cst_108 [1] : vector<5x5xf32> to vector<5xf32>
    %226 = vector.shape_cast %225 : vector<5xf32> to vector<5x1xf32>
    %227 = tpu.reciprocal %226 {approx = true} : vector<5x1xf32> -> vector<5x1xf32>
    %228 = vector.broadcast %227 : vector<5x1xf32> to vector<5x5xf32>
    %229 = arith.mulf %224, %228 : vector<5x5xf32>
    %230 = vector.extract_strided_slice %210 {offsets = [0, 0], sizes = [5, 8], strides = [1, 1]} : vector<5x32xf32> to vector<5x8xf32>
    %cst_109 = arith.constant dense<0.000000e+00> : vector<5x8xf32>
    %231 = tpu.matmul %229, %230, %cst_109 {dimension_numbers = #tpu.dot_dimension_numbers<[1], [0], [0], [1], [0, 0, 1, 1], [], []>} : vector<5x5xf32>, vector<5x8xf32>, vector<5x8xf32> -> vector<5x8xf32>
    %232 = vector.extract_strided_slice %212 {offsets = [0, 0], sizes = [8, 32], strides = [1, 1]} : vector<32x32xf32> to vector<8x32xf32>
    %cst_110 = arith.constant dense<0.000000e+00> : vector<5x32xf32>
    %233 = tpu.matmul %231, %232, %cst_110 {dimension_numbers = #tpu.dot_dimension_numbers<[1], [0], [0], [1], [0, 0, 1, 1], [], []>} : vector<5x8xf32>, vector<8x32xf32>, vector<5x32xf32> -> vector<5x32xf32>
    %234 = arith.addf %216, %233 : vector<5x32xf32>
    %235 = vector.extract_strided_slice %208 {offsets = [0, 8], sizes = [5, 8], strides = [1, 1]} : vector<5x32xf32> to vector<5x8xf32>
    %236 = vector.extract_strided_slice %209 {offsets = [0, 8], sizes = [5, 8], strides = [1, 1]} : vector<5x32xf32> to vector<5x8xf32>
    %cst_111 = arith.constant dense<0.000000e+00> : vector<5x5xf32>
    %237 = tpu.matmul %235, %236, %cst_111 {dimension_numbers = #tpu.dot_dimension_numbers<[1], [1], [0], [0], [0, 0, 1, 0], [], []>} : vector<5x8xf32>, vector<5x8xf32>, vector<5x5xf32> -> vector<5x5xf32>
    %cst_112 = arith.constant dense<0xFF800000> : vector<5xf32>
    %238 = vector.multi_reduction <maximumf>, %237, %cst_112 [1] : vector<5x5xf32> to vector<5xf32>
    %239 = vector.shape_cast %238 : vector<5xf32> to vector<5x1xf32>
    %240 = vector.broadcast %239 : vector<5x1xf32> to vector<5x5xf32>
    %241 = arith.subf %237, %240 : vector<5x5xf32>
    %242 = math.exp %241 : vector<5x5xf32>
    %cst_113 = arith.constant dense<0.000000e+00> : vector<5xf32>
    %243 = vector.multi_reduction <add>, %242, %cst_113 [1] : vector<5x5xf32> to vector<5xf32>
    %244 = vector.shape_cast %243 : vector<5xf32> to vector<5x1xf32>
    %245 = tpu.reciprocal %244 {approx = true} : vector<5x1xf32> -> vector<5x1xf32>
    %246 = vector.broadcast %245 : vector<5x1xf32> to vector<5x5xf32>
    %247 = arith.mulf %242, %246 : vector<5x5xf32>
    %248 = vector.extract_strided_slice %210 {offsets = [0, 8], sizes = [5, 8], strides = [1, 1]} : vector<5x32xf32> to vector<5x8xf32>
    %cst_114 = arith.constant dense<0.000000e+00> : vector<5x8xf32>
    %249 = tpu.matmul %247, %248, %cst_114 {dimension_numbers = #tpu.dot_dimension_numbers<[1], [0], [0], [1], [0, 0, 1, 1], [], []>} : vector<5x5xf32>, vector<5x8xf32>, vector<5x8xf32> -> vector<5x8xf32>
    %250 = vector.extract_strided_slice %212 {offsets = [8, 0], sizes = [8, 32], strides = [1, 1]} : vector<32x32xf32> to vector<8x32xf32>
    %cst_115 = arith.constant dense<0.000000e+00> : vector<5x32xf32>
    %251 = tpu.matmul %249, %250, %cst_115 {dimension_numbers = #tpu.dot_dimension_numbers<[1], [0], [0], [1], [0, 0, 1, 1], [], []>} : vector<5x8xf32>, vector<8x32xf32>, vector<5x32xf32> -> vector<5x32xf32>
    %252 = arith.addf %234, %251 : vector<5x32xf32>
    %253 = vector.extract_strided_slice %208 {offsets = [0, 16], sizes = [5, 8], strides = [1, 1]} : vector<5x32xf32> to vector<5x8xf32>
    %254 = vector.extract_strided_slice %209 {offsets = [0, 16], sizes = [5, 8], strides = [1, 1]} : vector<5x32xf32> to vector<5x8xf32>
    %cst_116 = arith.constant dense<0.000000e+00> : vector<5x5xf32>
    %255 = tpu.matmul %253, %254, %cst_116 {dimension_numbers = #tpu.dot_dimension_numbers<[1], [1], [0], [0], [0, 0, 1, 0], [], []>} : vector<5x8xf32>, vector<5x8xf32>, vector<5x5xf32> -> vector<5x5xf32>
    %cst_117 = arith.constant dense<0xFF800000> : vector<5xf32>
    %256 = vector.multi_reduction <maximumf>, %255, %cst_117 [1] : vector<5x5xf32> to vector<5xf32>
    %257 = vector.shape_cast %256 : vector<5xf32> to vector<5x1xf32>
    %258 = vector.broadcast %257 : vector<5x1xf32> to vector<5x5xf32>
    %259 = arith.subf %255, %258 : vector<5x5xf32>
    %260 = math.exp %259 : vector<5x5xf32>
    %cst_118 = arith.constant dense<0.000000e+00> : vector<5xf32>
    %261 = vector.multi_reduction <add>, %260, %cst_118 [1] : vector<5x5xf32> to vector<5xf32>
    %262 = vector.shape_cast %261 : vector<5xf32> to vector<5x1xf32>
    %263 = tpu.reciprocal %262 {approx = true} : vector<5x1xf32> -> vector<5x1xf32>
    %264 = vector.broadcast %263 : vector<5x1xf32> to vector<5x5xf32>
    %265 = arith.mulf %260, %264 : vector<5x5xf32>
    %266 = vector.extract_strided_slice %210 {offsets = [0, 16], sizes = [5, 8], strides = [1, 1]} : vector<5x32xf32> to vector<5x8xf32>
    %cst_119 = arith.constant dense<0.000000e+00> : vector<5x8xf32>
    %267 = tpu.matmul %265, %266, %cst_119 {dimension_numbers = #tpu.dot_dimension_numbers<[1], [0], [0], [1], [0, 0, 1, 1], [], []>} : vector<5x5xf32>, vector<5x8xf32>, vector<5x8xf32> -> vector<5x8xf32>
    %268 = vector.extract_strided_slice %212 {offsets = [16, 0], sizes = [8, 32], strides = [1, 1]} : vector<32x32xf32> to vector<8x32xf32>
    %cst_120 = arith.constant dense<0.000000e+00> : vector<5x32xf32>
    %269 = tpu.matmul %267, %268, %cst_120 {dimension_numbers = #tpu.dot_dimension_numbers<[1], [0], [0], [1], [0, 0, 1, 1], [], []>} : vector<5x8xf32>, vector<8x32xf32>, vector<5x32xf32> -> vector<5x32xf32>
    %270 = arith.addf %252, %269 : vector<5x32xf32>
    %271 = vector.extract_strided_slice %208 {offsets = [0, 24], sizes = [5, 8], strides = [1, 1]} : vector<5x32xf32> to vector<5x8xf32>
    %272 = vector.extract_strided_slice %209 {offsets = [0, 24], sizes = [5, 8], strides = [1, 1]} : vector<5x32xf32> to vector<5x8xf32>
    %cst_121 = arith.constant dense<0.000000e+00> : vector<5x5xf32>
    %273 = tpu.matmul %271, %272, %cst_121 {dimension_numbers = #tpu.dot_dimension_numbers<[1], [1], [0], [0], [0, 0, 1, 0], [], []>} : vector<5x8xf32>, vector<5x8xf32>, vector<5x5xf32> -> vector<5x5xf32>
    %cst_122 = arith.constant dense<0xFF800000> : vector<5xf32>
    %274 = vector.multi_reduction <maximumf>, %273, %cst_122 [1] : vector<5x5xf32> to vector<5xf32>
    %275 = vector.shape_cast %274 : vector<5xf32> to vector<5x1xf32>
    %276 = vector.broadcast %275 : vector<5x1xf32> to vector<5x5xf32>
    %277 = arith.subf %273, %276 : vector<5x5xf32>
    %278 = math.exp %277 : vector<5x5xf32>
    %cst_123 = arith.constant dense<0.000000e+00> : vector<5xf32>
    %279 = vector.multi_reduction <add>, %278, %cst_123 [1] : vector<5x5xf32> to vector<5xf32>
    %280 = vector.shape_cast %279 : vector<5xf32> to vector<5x1xf32>
    %281 = tpu.reciprocal %280 {approx = true} : vector<5x1xf32> -> vector<5x1xf32>
    %282 = vector.broadcast %281 : vector<5x1xf32> to vector<5x5xf32>
    %283 = arith.mulf %278, %282 : vector<5x5xf32>
    %284 = vector.extract_strided_slice %210 {offsets = [0, 24], sizes = [5, 8], strides = [1, 1]} : vector<5x32xf32> to vector<5x8xf32>
    %cst_124 = arith.constant dense<0.000000e+00> : vector<5x8xf32>
    %285 = tpu.matmul %283, %284, %cst_124 {dimension_numbers = #tpu.dot_dimension_numbers<[1], [0], [0], [1], [0, 0, 1, 1], [], []>} : vector<5x5xf32>, vector<5x8xf32>, vector<5x8xf32> -> vector<5x8xf32>
    %286 = vector.extract_strided_slice %212 {offsets = [24, 0], sizes = [8, 32], strides = [1, 1]} : vector<32x32xf32> to vector<8x32xf32>
    %cst_125 = arith.constant dense<0.000000e+00> : vector<5x32xf32>
    %287 = tpu.matmul %285, %286, %cst_125 {dimension_numbers = #tpu.dot_dimension_numbers<[1], [0], [0], [1], [0, 0, 1, 1], [], []>} : vector<5x8xf32>, vector<8x32xf32>, vector<5x32xf32> -> vector<5x32xf32>
    %288 = arith.addf %270, %287 : vector<5x32xf32>
    %c1_126 = arith.constant 1 : index
    %c0_127 = arith.constant 0 : index
    %c0_128 = arith.constant 0 : index
    %289 = vector.load %arg11[%c1_126, %c0_127, %c0_128] : memref<2x1x32xf32, #tpu.memory_space<vmem>>, vector<1x1x32xf32>
    %290 = vector.shape_cast %289 : vector<1x1x32xf32> to vector<1x32xf32>
    %c1_129 = arith.constant 1 : index
    %c0_130 = arith.constant 0 : index
    %c0_131 = arith.constant 0 : index
    %291 = vector.load %arg12[%c1_129, %c0_130, %c0_131] : memref<2x1x32xf32, #tpu.memory_space<vmem>>, vector<1x1x32xf32>
    %292 = vector.shape_cast %291 : vector<1x1x32xf32> to vector<1x32xf32>
    %cst_132 = arith.constant dense<0.000000e+00> : vector<5xf32>
    %293 = vector.multi_reduction <add>, %288, %cst_132 [1] : vector<5x32xf32> to vector<5xf32>
    %294 = vector.shape_cast %293 : vector<5xf32> to vector<5x1xf32>
    %cst_133 = arith.constant 3.200000e+01 : f32
    %295 = vector.broadcast %cst_133 : f32 to vector<5x1xf32>
    %296 = arith.divf %294, %295 : vector<5x1xf32>
    %297 = vector.broadcast %296 : vector<5x1xf32> to vector<5x32xf32>
    %298 = arith.subf %288, %297 : vector<5x32xf32>
    %299 = arith.mulf %298, %298 : vector<5x32xf32>
    %cst_134 = arith.constant dense<0.000000e+00> : vector<5xf32>
    %300 = vector.multi_reduction <add>, %299, %cst_134 [1] : vector<5x32xf32> to vector<5xf32>
    %301 = vector.shape_cast %300 : vector<5xf32> to vector<5x1xf32>
    %cst_135 = arith.constant 3.200000e+01 : f32
    %302 = vector.broadcast %cst_135 : f32 to vector<5x1xf32>
    %303 = arith.divf %301, %302 : vector<5x1xf32>
    %cst_136 = arith.constant 9.99999997E-7 : f32
    %304 = vector.broadcast %cst_136 : f32 to vector<5x1xf32>
    %305 = arith.addf %303, %304 : vector<5x1xf32>
    %306 = math.rsqrt %305 : vector<5x1xf32>
    %307 = vector.broadcast %306 : vector<5x1xf32> to vector<5x32xf32>
    %308 = arith.mulf %298, %307 : vector<5x32xf32>
    %309 = vector.broadcast %290 : vector<1x32xf32> to vector<5x32xf32>
    %310 = arith.mulf %308, %309 : vector<5x32xf32>
    %311 = vector.broadcast %292 : vector<1x32xf32> to vector<5x32xf32>
    %312 = arith.addf %310, %311 : vector<5x32xf32>
    %c1_137 = arith.constant 1 : index
    %c0_138 = arith.constant 0 : index
    %c0_139 = arith.constant 0 : index
    %313 = vector.load %arg13[%c1_137, %c0_138, %c0_139] : memref<2x32x128xf32, #tpu.memory_space<vmem>>, vector<1x32x128xf32>
    %314 = vector.shape_cast %313 : vector<1x32x128xf32> to vector<32x128xf32>
    %cst_140 = arith.constant dense<0.000000e+00> : vector<5x128xf32>
    %315 = tpu.matmul %312, %314, %cst_140 {dimension_numbers = #tpu.dot_dimension_numbers<[1], [0], [0], [1], [0, 0, 1, 1], [], []>} : vector<5x32xf32>, vector<32x128xf32>, vector<5x128xf32> -> vector<5x128xf32>
    %c1_141 = arith.constant 1 : index
    %c0_142 = arith.constant 0 : index
    %c0_143 = arith.constant 0 : index
    %316 = vector.load %arg14[%c1_141, %c0_142, %c0_143] : memref<2x1x128xf32, #tpu.memory_space<vmem>>, vector<1x1x128xf32>
    %317 = vector.shape_cast %316 : vector<1x1x128xf32> to vector<1x128xf32>
    %318 = vector.broadcast %317 : vector<1x128xf32> to vector<5x128xf32>
    %319 = arith.addf %315, %318 : vector<5x128xf32>
    %320 = arith.mulf %319, %319 : vector<5x128xf32>
    %321 = arith.mulf %319, %320 : vector<5x128xf32>
    %cst_144 = arith.constant 4.471500e-02 : f32
    %322 = vector.broadcast %cst_144 : f32 to vector<5x128xf32>
    %323 = arith.mulf %322, %321 : vector<5x128xf32>
    %324 = arith.addf %319, %323 : vector<5x128xf32>
    %cst_145 = arith.constant 0.797884583 : f32
    %325 = vector.broadcast %cst_145 : f32 to vector<5x128xf32>
    %326 = arith.mulf %325, %324 : vector<5x128xf32>
    %327 = math.tanh %326 : vector<5x128xf32>
    %cst_146 = arith.constant 1.000000e+00 : f32
    %328 = vector.broadcast %cst_146 : f32 to vector<5x128xf32>
    %329 = arith.addf %328, %327 : vector<5x128xf32>
    %cst_147 = arith.constant 5.000000e-01 : f32
    %330 = vector.broadcast %cst_147 : f32 to vector<5x128xf32>
    %331 = arith.mulf %330, %329 : vector<5x128xf32>
    %332 = arith.mulf %319, %331 : vector<5x128xf32>
    %c1_148 = arith.constant 1 : index
    %c0_149 = arith.constant 0 : index
    %c0_150 = arith.constant 0 : index
    %333 = vector.load %arg15[%c1_148, %c0_149, %c0_150] : memref<2x128x32xf32, #tpu.memory_space<vmem>>, vector<1x128x32xf32>
    %334 = vector.shape_cast %333 : vector<1x128x32xf32> to vector<128x32xf32>
    %cst_151 = arith.constant dense<0.000000e+00> : vector<5x32xf32>
    %335 = tpu.matmul %332, %334, %cst_151 {dimension_numbers = #tpu.dot_dimension_numbers<[1], [0], [0], [1], [0, 0, 1, 1], [], []>} : vector<5x128xf32>, vector<128x32xf32>, vector<5x32xf32> -> vector<5x32xf32>
    %336 = arith.addf %288, %335 : vector<5x32xf32>
    %c1_152 = arith.constant 1 : index
    %c0_153 = arith.constant 0 : index
    %c0_154 = arith.constant 0 : index
    %337 = vector.load %arg16[%c1_152, %c0_153, %c0_154] : memref<2x1x32xf32, #tpu.memory_space<vmem>>, vector<1x1x32xf32>
    %338 = vector.shape_cast %337 : vector<1x1x32xf32> to vector<1x32xf32>
    %339 = vector.broadcast %338 : vector<1x32xf32> to vector<5x32xf32>
    %340 = arith.addf %336, %339 : vector<5x32xf32>
    %c0_155 = arith.constant 0 : index
    %c0_156 = arith.constant 0 : index
    %341 = vector.load %arg17[%c0_155, %c0_156] : memref<1x32xf32, #tpu.memory_space<vmem>>, vector<1x32xf32>
    %c0_157 = arith.constant 0 : index
    %c0_158 = arith.constant 0 : index
    %342 = vector.load %arg18[%c0_157, %c0_158] : memref<1x32xf32, #tpu.memory_space<vmem>>, vector<1x32xf32>
    %cst_159 = arith.constant dense<0.000000e+00> : vector<5xf32>
    %343 = vector.multi_reduction <add>, %340, %cst_159 [1] : vector<5x32xf32> to vector<5xf32>
    %344 = vector.shape_cast %343 : vector<5xf32> to vector<5x1xf32>
    %cst_160 = arith.constant 3.200000e+01 : f32
    %345 = vector.broadcast %cst_160 : f32 to vector<5x1xf32>
    %346 = arith.divf %344, %345 : vector<5x1xf32>
    %347 = vector.broadcast %346 : vector<5x1xf32> to vector<5x32xf32>
    %348 = arith.subf %340, %347 : vector<5x32xf32>
    %349 = arith.mulf %348, %348 : vector<5x32xf32>
    %cst_161 = arith.constant dense<0.000000e+00> : vector<5xf32>
    %350 = vector.multi_reduction <add>, %349, %cst_161 [1] : vector<5x32xf32> to vector<5xf32>
    %351 = vector.shape_cast %350 : vector<5xf32> to vector<5x1xf32>
    %cst_162 = arith.constant 3.200000e+01 : f32
    %352 = vector.broadcast %cst_162 : f32 to vector<5x1xf32>
    %353 = arith.divf %351, %352 : vector<5x1xf32>
    %cst_163 = arith.constant 9.99999997E-7 : f32
    %354 = vector.broadcast %cst_163 : f32 to vector<5x1xf32>
    %355 = arith.addf %353, %354 : vector<5x1xf32>
    %356 = math.rsqrt %355 : vector<5x1xf32>
    %357 = vector.broadcast %356 : vector<5x1xf32> to vector<5x32xf32>
    %358 = arith.mulf %348, %357 : vector<5x32xf32>
    %359 = vector.broadcast %341 : vector<1x32xf32> to vector<5x32xf32>
    %360 = arith.mulf %358, %359 : vector<5x32xf32>
    %361 = vector.broadcast %342 : vector<1x32xf32> to vector<5x32xf32>
    %362 = arith.addf %360, %361 : vector<5x32xf32>
    %363 = vector.extract_strided_slice %362 {offsets = [1, 0], sizes = [4, 32], strides = [1, 1]} : vector<5x32xf32> to vector<4x32xf32>
    %c0_164 = arith.constant 0 : index
    %c0_165 = arith.constant 0 : index
    %364 = vector.load %arg19[%c0_164, %c0_165] : memref<16x32xf32, #tpu.memory_space<vmem>>, vector<16x32xf32>
    %cst_166 = arith.constant dense<0.000000e+00> : vector<16x4xf32>
    %365 = tpu.matmul %364, %363, %cst_166 {dimension_numbers = #tpu.dot_dimension_numbers<[1], [1], [0], [0], [0, 0, 1, 0], [], []>} : vector<16x32xf32>, vector<4x32xf32>, vector<16x4xf32> -> vector<16x4xf32>
    %c0_167 = arith.constant 0 : index
    %c0_168 = arith.constant 0 : index
    %366 = vector.load %arg20[%c0_167, %c0_168] : memref<16x1xf32, #tpu.memory_space<vmem>>, vector<16x1xf32>
    %367 = vector.broadcast %366 : vector<16x1xf32> to vector<16x4xf32>
    %368 = arith.addf %365, %367 : vector<16x4xf32>
    %c0_169 = arith.constant 0 : index
    %c0_170 = arith.constant 0 : index
    %369 = vector.load %arg21[%c0_169, %c0_170] : memref<4x256xf32, #tpu.memory_space<vmem>>, vector<4x256xf32>
    %cst_171 = arith.constant dense<0.000000e+00> : vector<16x256xf32>
    %370 = tpu.matmul %368, %369, %cst_171 {dimension_numbers = #tpu.dot_dimension_numbers<[1], [0], [0], [1], [0, 0, 1, 1], [], []>} : vector<16x4xf32>, vector<4x256xf32>, vector<16x256xf32> -> vector<16x256xf32>
    %c0_172 = arith.constant 0 : index
    %c0_173 = arith.constant 0 : index
    %c0_174 = arith.constant 0 : index
    %371 = vector.load %arg22[%c0_172, %c0_173, %c0_174] : memref<1x16x256xf32, #tpu.memory_space<vmem>>, vector<1x16x256xf32>
    %372 = vector.shape_cast %371 : vector<1x16x256xf32> to vector<16x256xf32>
    %373 = vector.shape_cast %370 : vector<16x256xf32> to vector<1x16x256xf32>
    tpu.vector_store %arg22[%c0_172, %c0_173, %c0_174], %373 {strides = array<i32>} : memref<1x16x256xf32, #tpu.memory_space<vmem>>, vector<1x16x256xf32>,
    return
  }
  func.func @transform_0(%arg0: i32) -> (i32, i32, i32) {
    %c0_i32 = arith.constant 0 : i32
    %c0_i32_0 = arith.constant 0 : i32
    %c0_i32_1 = arith.constant 0 : i32
    return %arg0, %c0_i32, %c0_i32_0 : i32, i32, i32
  }
  func.func @transform_1(%arg0: i32) -> (i32, i32) {
    %c0_i32 = arith.constant 0 : i32
    %c0_i32_0 = arith.constant 0 : i32
    %c0_i32_1 = arith.constant 0 : i32
    return %c0_i32, %c0_i32_0 : i32, i32
  }
  func.func @transform_2(%arg0: i32) -> (i32, i32) {
    %c0_i32 = arith.constant 0 : i32
    %c0_i32_0 = arith.constant 0 : i32
    %c0_i32_1 = arith.constant 0 : i32
    return %c0_i32, %c0_i32_0 : i32, i32
  }
  func.func @transform_3(%arg0: i32) -> (i32, i32) {
    %c0_i32 = arith.constant 0 : i32
    %c0_i32_0 = arith.constant 0 : i32
    %c0_i32_1 = arith.constant 0 : i32
    return %c0_i32, %c0_i32_0 : i32, i32
  }
  func.func @transform_4(%arg0: i32) -> (i32, i32, i32) {
    %c0_i32 = arith.constant 0 : i32
    %c0_i32_0 = arith.constant 0 : i32
    %c0_i32_1 = arith.constant 0 : i32
    %c0_i32_2 = arith.constant 0 : i32
    return %c0_i32, %c0_i32_0, %c0_i32_1 : i32, i32, i32
  }
  func.func @transform_5(%arg0: i32) -> (i32, i32, i32) {
    %c0_i32 = arith.constant 0 : i32
    %c0_i32_0 = arith.constant 0 : i32
    %c0_i32_1 = arith.constant 0 : i32
    %c0_i32_2 = arith.constant 0 : i32
    return %c0_i32, %c0_i32_0, %c0_i32_1 : i32, i32, i32
  }
  func.func @transform_6(%arg0: i32) -> (i32, i32, i32) {
    %c0_i32 = arith.constant 0 : i32
    %c0_i32_0 = arith.constant 0 : i32
    %c0_i32_1 = arith.constant 0 : i32
    %c0_i32_2 = arith.constant 0 : i32
    return %c0_i32, %c0_i32_0, %c0_i32_1 : i32, i32, i32
  }
  func.func @transform_7(%arg0: i32) -> (i32, i32, i32) {
    %c0_i32 = arith.constant 0 : i32
    %c0_i32_0 = arith.constant 0 : i32
    %c0_i32_1 = arith.constant 0 : i32
    %c0_i32_2 = arith.constant 0 : i32
    return %c0_i32, %c0_i32_0, %c0_i32_1 : i32, i32, i32
  }
  func.func @transform_8(%arg0: i32) -> (i32, i32, i32) {
    %c0_i32 = arith.constant 0 : i32
    %c0_i32_0 = arith.constant 0 : i32
    %c0_i32_1 = arith.constant 0 : i32
    %c0_i32_2 = arith.constant 0 : i32
    return %c0_i32, %c0_i32_0, %c0_i32_1 : i32, i32, i32
  }
  func.func @transform_9(%arg0: i32) -> (i32, i32, i32) {
    %c0_i32 = arith.constant 0 : i32
    %c0_i32_0 = arith.constant 0 : i32
    %c0_i32_1 = arith.constant 0 : i32
    %c0_i32_2 = arith.constant 0 : i32
    return %c0_i32, %c0_i32_0, %c0_i32_1 : i32, i32, i32
  }
  func.func @transform_10(%arg0: i32) -> (i32, i32, i32) {
    %c0_i32 = arith.constant 0 : i32
    %c0_i32_0 = arith.constant 0 : i32
    %c0_i32_1 = arith.constant 0 : i32
    %c0_i32_2 = arith.constant 0 : i32
    return %c0_i32, %c0_i32_0, %c0_i32_1 : i32, i32, i32
  }
  func.func @transform_11(%arg0: i32) -> (i32, i32, i32) {
    %c0_i32 = arith.constant 0 : i32
    %c0_i32_0 = arith.constant 0 : i32
    %c0_i32_1 = arith.constant 0 : i32
    %c0_i32_2 = arith.constant 0 : i32
    return %c0_i32, %c0_i32_0, %c0_i32_1 : i32, i32, i32
  }
  func.func @transform_12(%arg0: i32) -> (i32, i32, i32) {
    %c0_i32 = arith.constant 0 : i32
    %c0_i32_0 = arith.constant 0 : i32
    %c0_i32_1 = arith.constant 0 : i32
    %c0_i32_2 = arith.constant 0 : i32
    return %c0_i32, %c0_i32_0, %c0_i32_1 : i32, i32, i32
  }
  func.func @transform_13(%arg0: i32) -> (i32, i32, i32) {
    %c0_i32 = arith.constant 0 : i32
    %c0_i32_0 = arith.constant 0 : i32
    %c0_i32_1 = arith.constant 0 : i32
    %c0_i32_2 = arith.constant 0 : i32
    return %c0_i32, %c0_i32_0, %c0_i32_1 : i32, i32, i32
  }
  func.func @transform_14(%arg0: i32) -> (i32, i32, i32) {
    %c0_i32 = arith.constant 0 : i32
    %c0_i32_0 = arith.constant 0 : i32
    %c0_i32_1 = arith.constant 0 : i32
    %c0_i32_2 = arith.constant 0 : i32
    return %c0_i32, %c0_i32_0, %c0_i32_1 : i32, i32, i32
  }
  func.func @transform_15(%arg0: i32) -> (i32, i32, i32) {
    %c0_i32 = arith.constant 0 : i32
    %c0_i32_0 = arith.constant 0 : i32
    %c0_i32_1 = arith.constant 0 : i32
    %c0_i32_2 = arith.constant 0 : i32
    return %c0_i32, %c0_i32_0, %c0_i32_1 : i32, i32, i32
  }
  func.func @transform_16(%arg0: i32) -> (i32, i32) {
    %c0_i32 = arith.constant 0 : i32
    %c0_i32_0 = arith.constant 0 : i32
    %c0_i32_1 = arith.constant 0 : i32
    return %c0_i32, %c0_i32_0 : i32, i32
  }
  func.func @transform_17(%arg0: i32) -> (i32, i32) {
    %c0_i32 = arith.constant 0 : i32
    %c0_i32_0 = arith.constant 0 : i32
    %c0_i32_1 = arith.constant 0 : i32
    return %c0_i32, %c0_i32_0 : i32, i32
  }
  func.func @transform_18(%arg0: i32) -> (i32, i32) {
    %c0_i32 = arith.constant 0 : i32
    %c0_i32_0 = arith.constant 0 : i32
    %c0_i32_1 = arith.constant 0 : i32
    return %c0_i32, %c0_i32_0 : i32, i32
  }
  func.func @transform_19(%arg0: i32) -> (i32, i32) {
    %c0_i32 = arith.constant 0 : i32
    %c0_i32_0 = arith.constant 0 : i32
    %c0_i32_1 = arith.constant 0 : i32
    return %c0_i32, %c0_i32_0 : i32, i32
  }
  func.func @transform_20(%arg0: i32) -> (i32, i32) {
    %c0_i32 = arith.constant 0 : i32
    %c0_i32_0 = arith.constant 0 : i32
    %c0_i32_1 = arith.constant 0 : i32
    return %c0_i32, %c0_i32_0 : i32, i32
  }
  func.func @transform_21(%arg0: i32) -> (i32, i32, i32) {
    %c0_i32 = arith.constant 0 : i32
    %c0_i32_0 = arith.constant 0 : i32
    %c0_i32_1 = arith.constant 0 : i32
    return %arg0, %c0_i32, %c0_i32_0 : i32, i32, i32
  }
}

</mosaic_0001>

<bundles_post_ra>
// kernel: segmenter_forward.1
= control target key start
LH: loop header
LB: loop body
LE: loop exit
PB: predicated region body
PF: predicated region fallthrough
CT: control target
= control target key end

     0   :  { %s4985_s0 = inlined_call_operand.vmem [shape: f32[2,5,192], index: 0, kind: input, shape index: {}]   ;;  %s4986_s1 = inlined_call_operand.vmem [shape: f32[5,32], index: 1, kind: input, shape index: {}]   ;;  %s4987_s2 = inlined_call_operand.vmem [shape: f32[192,32], index: 2, kind: input, shape index: {}]   ;;  %s4988_s3 = inlined_call_operand.vmem [shape: f32[1,32], index: 3, kind: input, shape index: {}]   ;;  %s4989_s4 = inlined_call_operand.vmem [shape: f32[2,1,32], index: 4, kind: input, shape index: {}]   ;;  %s4990_s5 = inlined_call_operand.vmem [shape: f32[2,1,32], index: 5, kind: input, shape index: {}]   ;;  %s4991_s6 = inlined_call_operand.vmem [shape: f32[2,32,96], index: 6, kind: input, shape index: {}]   ;;  %s4992_s7 = inlined_call_operand.vmem [shape: f32[2,1,96], index: 7, kind: input, shape index: {}]   ;;  %s4993_s8 = inlined_call_operand.vmem [shape: f32[2,32,32], index: 8, kind: input, shape index: {}]   ;;  %s4994_s9 = inlined_call_operand.vmem [shape: f32[2,1,32], index: 9, kind: input, shape index: {}]   ;;  %s4995_s10 = inlined_call_operand.vmem [shape: f32[2,1,32], index: 10, kind: input, shape index: {}]   ;;  %s4996_s11 = inlined_call_operand.vmem [shape: f32[2,1,32], index: 11, kind: input, shape index: {}]   ;;  %s4997_s12 = inlined_call_operand.vmem [shape: f32[2,32,128], index: 12, kind: input, shape index: {}]   ;;  %s4998_s13 = inlined_call_operand.vmem [shape: f32[2,1,128], index: 13, kind: input, shape index: {}]   ;;  %s4999_s14 = inlined_call_operand.vmem [shape: f32[2,128,32], index: 14, kind: input, shape index: {}]   ;;  %s5000_s15 = inlined_call_operand.vmem [shape: f32[2,1,32], index: 15, kind: input, shape index: {}]   ;;  %s5001_s16 = inlined_call_operand.vmem [shape: f32[1,32], index: 16, kind: input, shape index: {}]   ;;  %s5002_s17 = inlined_call_operand.vmem [shape: f32[1,32], index: 17, kind: input, shape index: {}]   ;;  %s5003_s18 = inlined_call_operand.vmem [shape: f32[16,32], index: 18, kind: input, shape index: {}]   ;;  %s5004_s19 = inlined_call_operand.vmem [shape: f32[16,1], index: 19, kind: input, shape index: {}]   ;;  %s5005_s20 = inlined_call_operand.vmem [shape: f32[4,256], index: 20, kind: input, shape index: {}]   ;;  %s5006_s21 = inlined_call_operand.vmem [shape: f32[2,16,256], index: 21, kind: output, shape index: {}]  }
   0x1   :  { %5019 = sst [smem:[#allocation2_spill]] %s4985_s0 }
   0x2   :  { %5020 = sst [smem:[#allocation3_spill]] %s4986_s1 }
   0x3   :  { %5021 = sst [smem:[#allocation4_spill]] %s4987_s2  ;;  %s4337_s2 = smov 0  }
   0x4   :  { %5022 = sst [smem:[#allocation5_spill]] %s4988_s3 }
   0x5   :  { %5023 = sst [smem:[#allocation6_spill]] %s4989_s4 }
   0x6   :  { %5024 = sst [smem:[#allocation7_spill]] %s4990_s5 }
   0x7 LB: > { %s3670_s25 = sadd.s32 4294967295, %s4211_s2   ;;  %p3674_p0 = scmp.ge.s32.totalorder %s4211_s2, 1  ;;  %s4211_s2 = sphi %s4337_s2, %s31_s2  }
   0x8   : > { %p587_p1 = scmp.lt.s32.totalorder %s4211_s2, 3 }
   0xa   : > { %p588_p2 = pnand %p3674_p0, %p587_p1 }
   0xb   : > { %s5025_s3 = sld [smem:[#allocation4_spill]] (!%p588_p2)  ;;  %p647_p3 = scmp.lt.s32.totalorder (!%p588_p2), %s3670_s25, 1 }
   0xc   : > { %591 = sbr.rel (%p588_p2) target bundleno = 9288 (0x2448), region = 104  ;;  %s5026_s24 = sld [smem:[#allocation2_spill]] (!%p588_p2) }
   0xd   : > { %s5027_s1 = sld [smem:[#allocation5_spill]] (!%p588_p2)  ;;  %s5017_s5 = smov (!%p588_p2), 64  }
   0xe   : > { %s5028_s28 = sld [smem:[#allocation3_spill]] (!%p588_p2)  ;;  %s4217_s22 = smov (!%p588_p2), 88  }
   0xf   : > { %s5029_s27 = sld [smem:[#allocation6_spill]] (!%p588_p2)  ;;  %s5018_s23 = smov (!%p588_p2), 120  }
  0x10   : > { %s5030_s29 = sld [smem:[#allocation7_spill]] (!%p588_p2)  ;;  %s5011_s0 = smov (!%p588_p2), 112  }
  0x11   : > { %v674_v0 = vld [vmem:[%s5025_s3 + $0x78] sm:$0xff]  ;;  %v4213_v1 = vmov 0.0   ;;  %v673_v2 = vld [vmem:[%s5025_s3 + $0x70] sm:$0xff]  ;;  %s5041_s25 = smov (!%p647_p3, %s3670_s25), 1  ;;  %v672_v3 = vld [vmem:[%s5025_s3 + $0x68] sm:$0xff]  ;;  %vm690_vm0 = vcmask 523264  }
  0x12   : > { %694 = vmatprep.subr.mxu0 %v4213_v1  ;;  %3906 = vmatprep.subr.mxu1 %v4213_v1  ;;  %s3788_s30 = sshll.u32 %s5041_s25, 4  ;;  %v671_v4 = vld [vmem:[%s5025_s3 + $0x60] sm:$0xff]  ;;  %v670_v5 = vld [vmem:[%s5025_s3 + $0x58] sm:$0xff]  ;;  %v669_v7 = vld [vmem:[%s5025_s3 + $0x50] sm:$0xff]  ;;  %vm768_vm1 = vcmask 258048   ;;  %vm4214_vm2 = vmmov 0  }
  0x13   : > { %695 = vmatpush1.msra.mxu0 %v674_v0  ;;  %s4367_s26 = scalar_lea.vmem %s5026_s24, %s3788_s30  ;;  %v668_v8 = vld [vmem:[%s5025_s3 + $0x48] sm:$0xff]  ;;  %v667_v9 = vld [vmem:[%s5025_s3 + $0x40] sm:$0xff]  ;;  %v666_v10 = vld [vmem:[%s5025_s3 + $0x38] sm:$0xff]  ;;  %3908 = vmatprep.mubr.msk.f32.mxu1 %vm4214_vm2, %v4213_v1  ;;  %vm808_vm3 = vcmask 261120   ;;  %s4215_s30 = smov 96   ;;  %vm898_vm4 = vcmask 64512  }
  0x14   : > { %696 = vmatprep.subr.mxu0 %v4213_v1  ;;  %v658_v6 = vld [vmem:[%s4367_s26 + $0x8] sm:$0x1f]  ;;  %v665_v11 = vld [vmem:[%s5025_s3 + $0x30] sm:$0xff]  ;;  %v663_v13 = vld [vmem:[%s5025_s3 + $0x20] sm:$0xff]  ;;  %vm974_vm5 = vcmask 36864   ;;  %vm992_vm6 = vcmask 1044480  }
  0x15   : > { %697 = vmatpush1.msra.mxu0 %v673_v2  ;;  %3680 = vmatprep.mubr.msk.f32.mxu0 %vm690_vm0, %v658_v6  ;;  %v664_v12 = vld [vmem:[%s5025_s3 + $0x28] sm:$0xff]  ;;  %v662_v14 = vld [vmem:[%s5025_s3 + $0x18] sm:$0xff]  ;;  %v661_v15 = vld [vmem:[%s5025_s3 + $0x10] sm:$0xff]  ;;  %vm988_vm7 = vcmask 39936   ;;  %s5012_s24 = smov 72   ;;  %s5014_s4 = smov 104  }
  0x16   : > { %698 = vmatprep.subr.mxu0 %v4213_v1  ;;  %v660_v16 = vld [vmem:[%s5025_s3 + $0x8] sm:$0xff]  ;;  %v659_v17 = vld [vmem:[%s5025_s3] sm:$0xff]  ;;  %v682_v18 = vld [vmem:[%s5025_s3 + $0xb8] sm:$0xff]  ;;  %vm3529_vm8 = vcmask 1043456   ;;  %vm3522_vm9 = vcmask 31744  }
  0x17   : > { %699 = vmatpush1.msra.mxu0 %v672_v3  ;;  %v681_v19 = vld [vmem:[%s5025_s3 + $0xb0] sm:$0xff]  ;;  %v680_v20 = vld [vmem:[%s5025_s3 + $0xa8] sm:$0xff]  ;;  %v679_v21 = vld [vmem:[%s5025_s3 + $0xa0] sm:$0xff] }
  0x18   : > { %700 = vmatprep.subr.mxu0 %v4213_v1  ;;  %v678_v22 = vld [vmem:[%s5025_s3 + $0x98] sm:$0xff]  ;;  %v677_v23 = vld [vmem:[%s5025_s3 + $0x90] sm:$0xff]  ;;  %v676_v24 = vld [vmem:[%s5025_s3 + $0x88] sm:$0xff] }
  0x19   : > { %701 = vmatpush1.msra.mxu0 %v671_v4  ;;  %v675_v25 = vld [vmem:[%s5025_s3 + $0x80] sm:$0xff]  ;;  %v800_v39 = vld [vmem:[%s4991_s6 + $0x18] sm:$0xff]  ;;  %v799_v40 = vld [vmem:[%s4991_s6 + $0x10] sm:$0xff] }
  0x1a   : > { %702 = vmatprep.subr.mxu0 %v4213_v1  ;;  %v657_v26 = vld [vmem:[%s4367_s26] sm:$0x1f]  ;;  %v798_v41 = vld [vmem:[%s4991_s6 + $0x8] sm:$0xff]  ;;  %s5010_s26 = smov 80  }
  0x1b   : > { %703 = vmatpush1.msra.mxu0 %v670_v5  ;;  %v3679_v27 = vld [vmem:[%s5027_s1] ss:$0 sm:$0xff]  ;;  %s5015_s1 = smov 48  }
  0x1c   : > { %704 = vmatprep.subr.mxu0 %v4213_v1  ;;  %v764_v29 = vld [vmem:[%s5028_s28] sm:$0x1f]  ;;  %s5016_s28 = smov 56  }
  0x1d   : > { %705 = vmatpush1.msra.mxu0 %v669_v7  ;;  %v797_v42 = vld [vmem:[%s4991_s6] sm:$0xff] }
  0x1e   : > { %706 = vmatprep.subr.mxu0 %v4213_v1  ;;  %v3681_v47 = vld [vmem:[%s5029_s27] ss:$0 sm:$0xff] }
  0x1f   : > { %707 = vmatpush1.msra.mxu0 %v668_v8  ;;  %v3682_v49 = vld [vmem:[%s5030_s29] ss:$0 sm:$0xff] }
  0x20   : > { %708 = vmatprep.subr.mxu0 %v4213_v1  ;;  %v3683_v52 = vld [vmem:[%s4992_s7] ss:$0 sm:$0xff] }
  0x21   : > { %709 = vmatpush1.msra.mxu0 %v667_v9  ;;  %v883_v7 = vld [vmem:[%s4993_s8] sm:$0xff] }
  0x22   : > { %710 = vmatprep.subr.mxu0 %v4213_v1 }
  0x23   : > { %711 = vmatpush1.msra.mxu0 %v666_v10 }
  0x24   : > { %712 = vmatprep.subr.mxu0 %v4213_v1 }
  0x25   : > { %713 = vmatpush1.msra.mxu0 %v665_v11 }
  0x26   : > { %714 = vmatprep.subr.mxu0 %v4213_v1 }
  0x27   : > { %715 = vmatpush1.msra.mxu0 %v664_v12 }
  0x28   : > { %716 = vmatprep.subr.mxu0 %v4213_v1 }
  0x29   : > { %717 = vmatpush1.msra.mxu0 %v663_v13 }
  0x2a   : > { %718 = vmatprep.subr.mxu0 %v4213_v1 }
  0x2b   : > { %719 = vmatpush1.msra.mxu0 %v662_v14 }
  0x2c   : > { %720 = vmatprep.subr.mxu0 %v4213_v1 }
  0x2d   : > { %721 = vmatpush1.msra.mxu0 %v661_v15 }
  0x2e   : > { %722 = vmatprep.subr.mxu0 %v4213_v1 }
  0x2f   : > { %723 = vmatpush1.msra.mxu0 %v660_v16 }
  0x30   : > { %724 = vmatprep.subr.mxu0 %v4213_v1 }
  0x31   : > { %725 = vmatpush1.msra.mxu0 %v659_v17 }
  0x32   : > { %742 = vmatprep.subr.mxu0 %v4213_v1 }
  0x33   : > { %743 = vmatpush2.msra.mxu0 %v682_v18 }
  0x34   : > { %744 = vmatprep.subr.mxu0 %v4213_v1 }
  0x35   : > { %745 = vmatpush2.msra.mxu0 %v681_v19 }
  0x36   : > { %746 = vmatprep.subr.mxu0 %v4213_v1 }
  0x37   : > { %747 = vmatpush2.msra.mxu0 %v680_v20 }
  0x38   : > { %748 = vmatprep.subr.mxu0 %v4213_v1 }
  0x39   : > { %749 = vmatpush2.msra.mxu0 %v679_v21 }
  0x3a   : > { %750 = vmatprep.subr.mxu0 %v4213_v1 }
  0x3b   : > { %751 = vmatpush2.msra.mxu0 %v678_v22 }
  0x3c   : > { %752 = vmatprep.subr.mxu0 %v4213_v1 }
  0x3d   : > { %753 = vmatpush2.msra.mxu0 %v677_v23 }
  0x3e   : > { %754 = vmatprep.subr.mxu0 %v4213_v1 }
  0x3f   : > { %755 = vmatpush2.msra.mxu0 %v676_v24 }
  0x40   : > { %756 = vmatprep.subr.mxu0 %v4213_v1 }
  0x41   : > { %757 = vmatpush2.msra.mxu0 %v675_v25 }
  0x42   : > { %759 = vmatmul.mubr.f32.vlgmr.msra.gmra.mxu0 %v657_v26  ;;  %3895 = vmatprep.subr.mxu0 %v4213_v1  ;;  %v884_v26 = vld [vmem:[%s4993_s8 + $0x8] sm:$0xff] }
  0x43   : > { %3896 = vmatpush3.msra.mxu0 %v800_v39  ;;  %3903 = vmatprep.mubr.msk.f32.mxu0 %vm4214_vm2, %v4213_v1 }
  0x44   : > { %3897 = vmatprep.subr.mxu0 %v4213_v1 }
  0x45   : > { %3898 = vmatpush3.msra.mxu0 %v799_v40 }
  0x46   : > { %3899 = vmatprep.subr.mxu0 %v4213_v1 }
  0x47   : > { %3900 = vmatpush3.msra.mxu0 %v798_v41 }
  0x48   : > { %3901 = vmatprep.subr.mxu0 %v4213_v1 }
  0x49   : > { %3902 = vmatpush3.msra.mxu0 %v797_v42 }
  0x4a   : > { %3956 = vmatprep.subr.mxu0 %v4213_v1 }
 0x102   : > { %v760_v28 = vpop.f32.mrf.mxu0 }
 0x103   : > { %v761_v30 = vadd.f32 %v3679_v27, %v760_v28 }
 0x104   : > { %v762_v31 = vpop.f32.mrf.mxu0 }
 0x105   : > { %v4459_v32 = vadd.f32 %v764_v29, %v761_v30  ;;  %v3685_v31 = vld [vmem:[%s4994_s9] ss:$0 sm:$0xff] }
 0x107   : > { %v769_v33 = vsel %vm768_vm1, %v4459_v32, 0.0 }
 0x108   : > { %770 = vadd.xlane.f32.xlu0 %v769_v33  ;;  %v894_v33 = vadd.f32 %v3685_v31, %v4459_v32  ;;  %v1996_v31 = vld [vmem:[%s4999_s14 + $0x78] sm:$0xff] }
 0x191   : > { %v771_v34 = vpop.xlane.xlu0 %770 }
 0x192   : > { %v773_v35 = vmul.f32 0.03125, %v771_v34 }
 0x194   : > { %v774_v36 = vsub.f32 %v4459_v32, %v773_v35 }
 0x196   : > { %v775_v37 = vmul.f32 %v774_v36, %v774_v36 }
 0x198   : > { %v776_v38 = vsel %vm768_vm1, %v775_v37, 0.0 }
 0x199   : > { %777 = vadd.xlane.f32.xlu0 %v776_v38 }
 0x222   : > { %v778_v43 = vpop.xlane.xlu0 %777 }
 0x223   : > { %v779_v44 = vmul.f32 0.03125, %v778_v43 }
 0x225   : > { %v780_v45 = vadd.f32 1e-06, %v779_v44 }
 0x227   : > { %4159 = vrsqrt.f32 %v780_v45 }
 0x234   : > { %v4160_v46 = vpop.eup %4159 }
 0x235   : > { %v782_v48 = vmul.f32 %v4160_v46, %v774_v36 }
 0x237   : > { %v789_v50 = vmul.f32 %v3681_v47, %v782_v48 }
 0x239   : > { %v796_v51 = vadd.f32 %v3682_v49, %v789_v50  ;;  %v885_v49 = vld [vmem:[%s4993_s8 + $0x10] sm:$0xff] }
 0x23b   : > { %3904 = vmatmul.mubr.msk.f32.vlgmr.msra.gmra.mxu0 %vm808_vm3, %v796_v51 }
 0x23c   : > { %3958 = vmatprep.mubr.msk.f32.mxu0 %vm4214_vm2, %v4213_v1 }
 0x2fb   : > { %v878_v53 = vpop.f32.mrf.mxu0 }
 0x2fc   : > { %v4497_v54 = vadd.f32 %v3683_v52, %v878_v53 }
 0x2fd   : > { %v3905_v55 = vpop.f32.mrf.mxu0 }
 0x2fe   : > { %896 = vrot.lane.b32.xlu1 %v4497_v54, %s4215_s30  ;;  %v4503_v57 = vmul.f32 0.35355338, %v4497_v54 }
 0x370   : > { %v897_v56 = vpop.permute.xlu1 %896 }
 0x371   : > { %3907 = vmatpush3.xpose.msk.msra.mxu1 %vm898_vm4, %v897_v56 }
 0x372   : > { %3911 = vmatprep.subr.mxu1 %v4213_v1 }
 0x374   : > { %3909 = vmatmul.mubr.msk.f32.vlgmr.msra.gmra.mxu1 %vm898_vm4, %v4503_v57 }
 0x375   : > { %3913 = vmatprep.mubr.msk.f32.mxu1 %vm4214_vm2, %v4213_v1 }
 0x434   : > { %v970_v58 = vpop.f32.mrf.mxu1 }
 0x435   : > { %v975_v59 = vsel %vm974_vm5, %v970_v58, -inf }
 0x436   : > { %976 = vmax.xlane.f32.xlu1 %v975_v59  ;;  %v3910_v60 = vpop.f32.mrf.mxu1 }
 0x4bf   : > { %v977_v61 = vpop.xlane.xlu1 %976 }
 0x4c0   : > { %v978_v62 = vsub.f32 %v970_v58, %v977_v61 }
 0x4c2   : > { %v979_v63 = vmul.f32 1.442695, %v978_v62 }
 0x4c4   : > { %4161 = vpow2.f32 %v979_v63 }
 0x4d1   : > { %v4162_v0 = vpop.eup %4161 }
 0x4d2   : > { %v981_v2 = vsel %vm974_vm5, %v4162_v0, 0.0 }
 0x4d3   : > { %982 = vadd.xlane.f32.xlu0 %v981_v2 }
 0x4e9   : > { %986 = vrot.lane.b32.xlu0 %v4497_v54, %s5017_s5 }
 0x4ed   : > { %1141 = vrot.lane.b32.xlu0 %v4497_v54, %s4217_s22 }
 0x4f1   : > { %1139 = vrot.lane.b32.xlu0 %v4503_v57, %s5018_s23  ;;  %s5036_s23 = smov 48  }
 0x55c   : > { %v983_v3 = vpop.xlane.xlu0 %982 }
 0x55d   : > { %4163 = vrcp.f32 %v983_v3 }
 0x560   : > { %v987_v4 = vpop.permute.xlu0 %986 }
 0x561   : > { %3912 = vmatpush3.msk.msra.mxu1 %vm992_vm6, %v987_v4  ;;  %v886_v4 = vld [vmem:[%s4993_s8 + $0x18] sm:$0xff] }
 0x562   : > { %3916 = vmatprep.subr.mxu1 %v4213_v1 }
 0x564   : > { %v1142_v8 = vpop.permute.xlu0 %1141 }
 0x568   : > { %v1140_v11 = vpop.permute.xlu0 %1139 }
 0x56a   : > { %v4164_v5 = vpop.eup %4163 }
 0x56b   : > { %v985_v6 = vmul.f32 %v4164_v5, %v4162_v0 }
 0x56d   : > { %3914 = vmatmul.mubr.msk.f32.vlgmr.msra.gmra.mxu1 %vm988_vm7, %v985_v6 }
 0x56e   : > { %3917 = vmatpush3.msra.mxu1 %v883_v7  ;;  %3918 = vmatprep.mubr.msk.f32.mxu1 %vm4214_vm2, %v4213_v1 }
 0x56f   : > { %3921 = vmatprep.subr.mxu1 %v4213_v1 }
 0x62d   : > { %v1061_v9 = vpop.f32.mrf.mxu1 }
 0x62e   : > { %3919 = vmatmul.mubr.msk.f32.vlgmr.msra.gmra.mxu1 %vm898_vm4, %v1061_v9 }
 0x62f   : > { %3922 = vmatpush3.xpose.msk.msra.mxu1 %vm898_vm4, %v1142_v8  ;;  %v3915_v10 = vpop.f32.mrf.mxu1  ;;  %3923 = vmatprep.mubr.msk.f32.mxu1 %vm4214_vm2, %v4213_v1 }
 0x630   : > { %3926 = vmatprep.subr.mxu1 %v4213_v1 }
 0x632   : > { %3924 = vmatmul.mubr.msk.f32.vlgmr.msra.gmra.mxu1 %vm898_vm4, %v1140_v11 }
 0x633   : > { %3928 = vmatprep.mubr.msk.f32.mxu1 %vm4214_vm2, %v4213_v1 }
 0x6ee   : > { %v1134_v12 = vpop.f32.mrf.mxu1 }
 0x6ef   : > { %v1138_v34 = vadd.f32 %v1134_v12, %v894_v33  ;;  %v1995_v33 = vld [vmem:[%s4999_s14 + $0x70] sm:$0xff] }
 0x6f0   : > { %v3920_v13 = vpop.f32.mrf.mxu1 }
 0x6f2   : > { %v1213_v14 = vpop.f32.mrf.mxu1 }
 0x6f3   : > { %v1217_v15 = vsel %vm974_vm5, %v1213_v14, -inf }
 0x6f4   : > { %1218 = vmax.xlane.f32.xlu1 %v1217_v15  ;;  %v3925_v16 = vpop.f32.mrf.mxu1 }
 0x705   : > { %1228 = vrot.lane.b32.xlu1 %v4497_v54, %s5016_s28  ;;  %s5033_s28 = smov 56  }
 0x709   : > { %1381 = vrot.lane.b32.xlu1 %v4497_v54, %s5010_s26  ;;  %s5013_s26 = smov 40  }
 0x70d   : > { %1379 = vrot.lane.b32.xlu1 %v4503_v57, %s5011_s0 }
 0x77d   : > { %v1219_v17 = vpop.xlane.xlu1 %1218 }
 0x77e   : > { %v1220_v18 = vsub.f32 %v1213_v14, %v1219_v17 }
 0x780   : > { %v1221_v19 = vmul.f32 1.442695, %v1220_v18  ;;  %v1891_v18 = vld [vmem:[%s4997_s12 + $0x18] sm:$0xff] }
 0x781   : > { %v1229_v20 = vpop.permute.xlu1 %1228 }
 0x782   : > { %4165 = vpow2.f32 %v1221_v19  ;;  %3927 = vmatpush3.msk.msra.mxu1 %vm992_vm6, %v1229_v20  ;;  %v1890_v19 = vld [vmem:[%s4997_s12 + $0x10] sm:$0xff]  ;;  %v1889_v20 = vld [vmem:[%s4997_s12 + $0x8] sm:$0xff] }
 0x783   : > { %3931 = vmatprep.subr.mxu1 %v4213_v1 }
 0x785   : > { %v1382_v27 = vpop.permute.xlu1 %1381 }
 0x789   : > { %v1380_v30 = vpop.permute.xlu1 %1379 }
 0x78f   : > { %v4166_v21 = vpop.eup %4165 }
 0x790   : > { %v1223_v22 = vsel %vm974_vm5, %v4166_v21, 0.0 }
 0x791   : > { %1224 = vadd.xlane.f32.xlu0 %v1223_v22 }
 0x81a   : > { %v1225_v23 = vpop.xlane.xlu0 %1224 }
 0x81b   : > { %4167 = vrcp.f32 %v1225_v23 }
 0x828   : > { %v4168_v24 = vpop.eup %4167 }
 0x829   : > { %v1227_v25 = vmul.f32 %v4168_v24, %v4166_v21  ;;  %v1888_v21 = vld [vmem:[%s4997_s12] sm:$0xff] }
 0x82b   : > { %3929 = vmatmul.mubr.msk.f32.vlgmr.msra.gmra.mxu1 %vm988_vm7, %v1227_v25 }
 0x82c   : > { %3932 = vmatpush3.msra.mxu1 %v884_v26  ;;  %3933 = vmatprep.mubr.msk.f32.mxu1 %vm4214_vm2, %v4213_v1  ;;  %v3706_v26 = vld [vmem:[%s4995_s10] ss:$0 sm:$0xff] }
 0x82d   : > { %3936 = vmatprep.subr.mxu1 %v4213_v1 }
 0x8eb   : > { %v1301_v28 = vpop.f32.mrf.mxu1 }
 0x8ec   : > { %3934 = vmatmul.mubr.msk.f32.vlgmr.msra.gmra.mxu1 %vm898_vm4, %v1301_v28  ;;  %v3707_v28 = vld [vmem:[%s4996_s11] ss:$0 sm:$0xff] }
 0x8ed   : > { %3937 = vmatpush3.xpose.msk.msra.mxu1 %vm898_vm4, %v1382_v27  ;;  %v3930_v29 = vpop.f32.mrf.mxu1  ;;  %3938 = vmatprep.mubr.msk.f32.mxu1 %vm4214_vm2, %v4213_v1 }
 0x8ee   : > { %3941 = vmatprep.subr.mxu1 %v4213_v1 }
 0x8f0   : > { %3939 = vmatmul.mubr.msk.f32.vlgmr.msra.gmra.mxu1 %vm898_vm4, %v1380_v30 }
 0x8f1   : > { %3943 = vmatprep.mubr.msk.f32.mxu1 %vm4214_vm2, %v4213_v1 }
 0x9ac   : > { %v1374_v35 = vpop.f32.mrf.mxu1 }
 0x9ad   : > { %v1378_v36 = vadd.f32 %v1374_v35, %v1138_v34  ;;  %v1994_v34 = vld [vmem:[%s4999_s14 + $0x68] sm:$0xff]  ;;  %v1993_v35 = vld [vmem:[%s4999_s14 + $0x60] sm:$0xff] }
 0x9ae   : > { %v3935_v37 = vpop.f32.mrf.mxu1 }
 0x9af   : > { %v1991_v37 = vld [vmem:[%s4999_s14 + $0x50] sm:$0xff] }
 0x9b0   : > { %v1453_v38 = vpop.f32.mrf.mxu1 }
 0x9b1   : > { %v1457_v39 = vsel %vm974_vm5, %v1453_v38, -inf }
 0x9b2   : > { %1458 = vmax.xlane.f32.xlu1 %v1457_v39  ;;  %v3940_v40 = vpop.f32.mrf.mxu1  ;;  %v1989_v39 = vld [vmem:[%s4999_s14 + $0x40] sm:$0xff] }
 0x9b3   : > { %v1988_v40 = vld [vmem:[%s4999_s14 + $0x38] sm:$0xff] }
 0xa3b   : > { %v1459_v41 = vpop.xlane.xlu1 %1458 }
 0xa3c   : > { %v1460_v42 = vsub.f32 %v1453_v38, %v1459_v41  ;;  %v1990_v38 = vld [vmem:[%s4999_s14 + $0x48] sm:$0xff]  ;;  %v1987_v41 = vld [vmem:[%s4999_s14 + $0x30] sm:$0xff] }
 0xa3e   : > { %v1461_v43 = vmul.f32 1.442695, %v1460_v42  ;;  %v1986_v42 = vld [vmem:[%s4999_s14 + $0x28] sm:$0xff] }
 0xa40   : > { %4169 = vpow2.f32 %v1461_v43  ;;  %v1985_v43 = vld [vmem:[%s4999_s14 + $0x20] sm:$0xff] }
 0xa4d   : > { %v4170_v44 = vpop.eup %4169 }
 0xa4e   : > { %v1463_v45 = vsel %vm974_vm5, %v4170_v44, 0.0 }
 0xa4f   : > { %1464 = vadd.xlane.f32.xlu0 %v1463_v45  ;;  %v1983_v45 = vld [vmem:[%s4999_s14 + $0x10] sm:$0xff] }
 0xa65   : > { %1468 = vrot.lane.b32.xlu0 %v4497_v54, %s5015_s1  ;;  %s5034_s1 = smov 112  }
 0xa69   : > { %1621 = vrot.lane.b32.xlu0 %v4497_v54, %s5012_s24  ;;  %s5031_s24 = smov 120  }
 0xa6d   : > { %1619 = vrot.lane.b32.xlu0 %v4503_v57, %s5014_s4  ;;  %s5035_s4 = smov 80  }
 0xad8   : > { %v1465_v32 = vpop.xlane.xlu0 %1464 }
 0xad9   : > { %4171 = vrcp.f32 %v1465_v32  ;;  %v1982_v32 = vld [vmem:[%s4999_s14 + $0x8] sm:$0xff] }
 0xadc   : > { %v1469_v46 = vpop.permute.xlu0 %1468 }
 0xadd   : > { %3942 = vmatpush3.msk.msra.mxu1 %vm992_vm6, %v1469_v46  ;;  %v1981_v46 = vld [vmem:[%s4999_s14] sm:$0xff] }
 0xade   : > { %3946 = vmatprep.subr.mxu1 %v4213_v1 }
 0xae0   : > { %v1622_v50 = vpop.permute.xlu0 %1621 }
 0xae4   : > { %v1620_v53 = vpop.permute.xlu0 %1619 }
 0xae6   : > { %v4172_v47 = vpop.eup %4171 }
 0xae7   : > { %v1467_v48 = vmul.f32 %v4172_v47, %v4170_v44  ;;  %v1984_v44 = vld [vmem:[%s4999_s14 + $0x18] sm:$0xff]  ;;  %v3708_v47 = vld [vmem:[%s4998_s13] ss:$0 sm:$0xff] }
 0xae9   : > { %3944 = vmatmul.mubr.msk.f32.vlgmr.msra.gmra.mxu1 %vm988_vm7, %v1467_v48 }
 0xaea   : > { %3947 = vmatpush3.msra.mxu1 %v885_v49  ;;  %3948 = vmatprep.mubr.msk.f32.mxu1 %vm4214_vm2, %v4213_v1 }
 0xaeb   : > { %3951 = vmatprep.subr.mxu1 %v4213_v1 }
 0xba9   : > { %v1541_v51 = vpop.f32.mrf.mxu1 }
 0xbaa   : > { %3949 = vmatmul.mubr.msk.f32.vlgmr.msra.gmra.mxu1 %vm898_vm4, %v1541_v51 }
 0xbab   : > { %3952 = vmatpush3.xpose.msk.msra.mxu1 %vm898_vm4, %v1622_v50  ;;  %v3945_v52 = vpop.f32.mrf.mxu1  ;;  %3953 = vmatprep.mubr.msk.f32.mxu1 %vm4214_vm2, %v4213_v1 }
 0xbac   : > { %3961 = vmatprep.subr.mxu1 %v4213_v1 }
 0xbae   : > { %3954 = vmatmul.mubr.msk.f32.vlgmr.msra.gmra.mxu1 %vm898_vm4, %v1620_v53 }
 0xbaf   : > { %3963 = vmatprep.mubr.msk.f32.mxu1 %vm4214_vm2, %v4213_v1  ;;  %3962 = vmatpush3.msra.mxu1 %v886_v4 }
 0xbb0   : > { %3977 = vmatprep.subr.mxu1 %v4213_v1 }
 0xc6a   : > { %v1614_v55 = vpop.f32.mrf.mxu1 }
 0xc6b   : > { %v1618_v56 = vadd.f32 %v1614_v55, %v1378_v36  ;;  %v1992_v36 = vld [vmem:[%s4999_s14 + $0x58] sm:$0xff] }
 0xc6c   : > { %v3950_v57 = vpop.f32.mrf.mxu1 }
 0xc6e   : > { %v1693_v58 = vpop.f32.mrf.mxu1 }
 0xc6f   : > { %v1697_v59 = vsel %vm974_vm5, %v1693_v58, -inf }
 0xc70   : > { %1698 = vmax.xlane.f32.xlu1 %v1697_v59  ;;  %v3955_v60 = vpop.f32.mrf.mxu1 }
 0xc81   : > { %1708 = vrot.lane.b32.xlu1 %v4497_v54, %s5013_s26 }
 0xcf9   : > { %v1699_v61 = vpop.xlane.xlu1 %1698 }
 0xcfa   : > { %v1700_v62 = vsub.f32 %v1693_v58, %v1699_v61 }
 0xcfc   : > { %v1701_v63 = vmul.f32 1.442695, %v1700_v62  ;;  %v3710_v62 = vld [vmem:[%s5000_s15] ss:$0 sm:$0xff] }
 0xcfd   : > { %v1709_v0 = vpop.permute.xlu1 %1708 }
 0xcfe   : > { %4173 = vpow2.f32 %v1701_v63  ;;  %3957 = vmatpush3.msk.msra.mxu0 %vm992_vm6, %v1709_v0 }
 0xcff   : > { %3966 = vmatprep.subr.mxu0 %v4213_v1 }
 0xd0b   : > { %v4174_v2 = vpop.eup %4173 }
 0xd0c   : > { %v1703_v3 = vsel %vm974_vm5, %v4174_v2, 0.0 }
 0xd0d   : > { %1704 = vadd.xlane.f32.xlu0 %v1703_v3 }
 0xd96   : > { %v1705_v54 = vpop.xlane.xlu0 %1704 }
 0xd97   : > { %4175 = vrcp.f32 %v1705_v54 }
 0xda4   : > { %v4176_v5 = vpop.eup %4175 }
 0xda5   : > { %v1707_v6 = vmul.f32 %v4176_v5, %v4174_v2 }
 0xda7   : > { %3959 = vmatmul.mubr.msk.f32.vlgmr.msra.gmra.mxu0 %vm988_vm7, %v1707_v6 }
 0xda8   : > { %3974 = vmatprep.mubr.msk.f32.mxu0 %vm4214_vm2, %v4213_v1  ;;  %3967 = vmatpush3.msra.mxu0 %v1891_v18  ;;  %v3714_v18 = vld [vmem:[%s5030_s29 + $0x1] ss:$0 sm:$0xff] }
 0xda9   : > { %3968 = vmatprep.subr.mxu0 %v4213_v1 }
 0xdaa   : > { %3969 = vmatpush3.msra.mxu0 %v1890_v19 }
 0xdab   : > { %3970 = vmatprep.subr.mxu0 %v4213_v1 }
 0xdac   : > { %3971 = vmatpush3.msra.mxu0 %v1889_v20 }
 0xdad   : > { %3972 = vmatprep.subr.mxu0 %v4213_v1 }
 0xdae   : > { %3973 = vmatpush3.msra.mxu0 %v1888_v21  ;;  %v3720_v21 = vld [vmem:[%s4992_s7 + $0x1] ss:$0 sm:$0xff] }
 0xdaf   : > { %4012 = vmatprep.subr.mxu0 %v4213_v1 }
 0xe67   : > { %v1781_v7 = vpop.f32.mrf.mxu0 }
 0xe68   : > { %3964 = vmatmul.mubr.msk.f32.vlgmr.msra.gmra.mxu1 %vm898_vm4, %v1781_v7 }
 0xe69   : > { %v3960_v8 = vpop.f32.mrf.mxu0  ;;  %4009 = vmatprep.mubr.msk.f32.mxu1 %vm4214_vm2, %v4213_v1  ;;  %3978 = vmatpush3.msra.mxu1 %v1996_v31 }
 0xe6a   : > { %3979 = vmatprep.subr.mxu1 %v4213_v1  ;;  %v3718_v8 = vld [vmem:[%s4991_s6 + $0x38] sm:$0xff] }
 0xe6b   : > { %3980 = vmatpush3.msra.mxu1 %v1995_v33 }
 0xe6c   : > { %3981 = vmatprep.subr.mxu1 %v4213_v1 }
 0xe6d   : > { %3982 = vmatpush3.msra.mxu1 %v1994_v34 }
 0xe6e   : > { %3983 = vmatprep.subr.mxu1 %v4213_v1 }
 0xe6f   : > { %3984 = vmatpush3.msra.mxu1 %v1993_v35 }
 0xe70   : > { %3985 = vmatprep.subr.mxu1 %v4213_v1 }
 0xe71   : > { %3986 = vmatpush3.msra.mxu1 %v1992_v36 }
 0xe72   : > { %3987 = vmatprep.subr.mxu1 %v4213_v1 }
 0xe73   : > { %3988 = vmatpush3.msra.mxu1 %v1991_v37 }
 0xe74   : > { %3989 = vmatprep.subr.mxu1 %v4213_v1 }
 0xe75   : > { %3990 = vmatpush3.msra.mxu1 %v1990_v38 }
 0xe76   : > { %3991 = vmatprep.subr.mxu1 %v4213_v1 }
 0xe77   : > { %3992 = vmatpush3.msra.mxu1 %v1989_v39 }
 0xe78   : > { %3993 = vmatprep.subr.mxu1 %v4213_v1 }
 0xe79   : > { %3994 = vmatpush3.msra.mxu1 %v1988_v40  ;;  %v3722_v40 = vld [vmem:[%s4993_s8 + $0x20] sm:$0xff] }
 0xe7a   : > { %3995 = vmatprep.subr.mxu1 %v4213_v1 }
 0xe7b   : > { %3996 = vmatpush3.msra.mxu1 %v1987_v41 }
 0xe7c   : > { %3997 = vmatprep.subr.mxu1 %v4213_v1 }
 0xe7d   : > { %3998 = vmatpush3.msra.mxu1 %v1986_v42 }
 0xe7e   : > { %3999 = vmatprep.subr.mxu1 %v4213_v1 }
 0xe7f   : > { %4000 = vmatpush3.msra.mxu1 %v1985_v43 }
 0xe80   : > { %4001 = vmatprep.subr.mxu1 %v4213_v1 }
 0xe81   : > { %4002 = vmatpush3.msra.mxu1 %v1984_v44 }
 0xe82   : > { %4003 = vmatprep.subr.mxu1 %v4213_v1 }
 0xe83   : > { %4004 = vmatpush3.msra.mxu1 %v1983_v45 }
 0xe84   : > { %4005 = vmatprep.subr.mxu1 %v4213_v1 }
 0xe85   : > { %4006 = vmatpush3.msra.mxu1 %v1982_v32 }
 0xe86   : > { %4007 = vmatprep.subr.mxu1 %v4213_v1 }
 0xe87   : > { %4008 = vmatpush3.msra.mxu1 %v1981_v46 }
 0xe88   : > { %4048 = vmatprep.subr.mxu1 %v4213_v1 }
 0xf28   : > { %v1854_v9 = vpop.f32.mrf.mxu1 }
 0xf29   : > { %v4605_v10 = vadd.f32 %v1854_v9, %v1618_v56  ;;  %v3717_v9 = vld [vmem:[%s4991_s6 + $0x30] sm:$0xff] }
 0xf2a   : > { %v3965_v11 = vpop.f32.mrf.mxu1 }
 0xf2b   : > { %v1861_v12 = vsel %vm768_vm1, %v4605_v10, 0.0  ;;  %v3715_v11 = vld [vmem:[%s4991_s6 + $0x20] sm:$0xff] }
 0xf2c   : > { %1862 = vadd.xlane.f32.xlu1 %v1861_v12 }
 0xfb5   : > { %v1863_v13 = vpop.xlane.xlu1 %1862 }
 0xfb6   : > { %v1864_v14 = vmul.f32 0.03125, %v1863_v13 }
 0xfb8   : > { %v1865_v15 = vsub.f32 %v4605_v10, %v1864_v14 }
 0xfba   : > { %v1866_v16 = vmul.f32 %v1865_v15, %v1865_v15 }
 0xfbc   : > { %v1867_v17 = vsel %vm768_vm1, %v1866_v16, 0.0  ;;  %v3713_v16 = vld [vmem:[%s5029_s27 + $0x1] ss:$0 sm:$0xff] }
 0xfbd   : > { %1868 = vadd.xlane.f32.xlu0 %v1867_v17 }
0x1046   : > { %v1869_v22 = vpop.xlane.xlu0 %1868 }
0x1047   : > { %v1870_v23 = vmul.f32 0.03125, %v1869_v22 }
0x1049   : > { %v1871_v24 = vadd.f32 1e-06, %v1870_v23 }
0x104b   : > { %4177 = vrsqrt.f32 %v1871_v24 }
0x1058   : > { %v4178_v25 = vpop.eup %4177 }
0x1059   : > { %v1873_v27 = vmul.f32 %v4178_v25, %v1865_v15 }
0x105b   : > { %v1880_v29 = vmul.f32 %v3706_v26, %v1873_v27 }
0x105d   : > { %v1887_v30 = vadd.f32 %v3707_v28, %v1880_v29 }
0x105f   : > { %3975 = vmatmul.mubr.msk.f32.vlgmr.msra.gmra.mxu0 %vm808_vm3, %v1887_v30 }
0x1060   : > { %4020 = vmatprep.mubr.msk.f32.mxu0 %vm4214_vm2, %v4213_v1  ;;  %4013 = vmatpush3.msra.mxu0 %v3718_v8 }
0x1061   : > { %4014 = vmatprep.subr.mxu0 %v4213_v1 }
0x1062   : > { %4015 = vmatpush3.msra.mxu0 %v3717_v9 }
0x1063   : > { %4016 = vmatprep.subr.mxu0 %v4213_v1 }
0x111f   : > { %v1968_v48 = vpop.f32.mrf.mxu0 }
0x1120   : > { %v1969_v49 = vadd.f32 %v3708_v47, %v1968_v48 }
0x1121   : > { %v3976_v50 = vpop.f32.mrf.mxu0 }
0x1122   : > { %v1972_v51 = vmul.f32 %v1969_v49, %v1969_v49 }
0x1124   : > { %v1973_v52 = vmul.f32 %v1972_v51, %v1969_v49 }
0x1126   : > { %v1974_v53 = vmul.f32 0.044715, %v1973_v52 }
0x1128   : > { %v1975_v55 = vadd.f32 %v1974_v53, %v1969_v49 }
0x112a   : > { %v1976_v56 = vmul.f32 0.7978846, %v1975_v55 }
0x112c   : > { %4179 = vtanh.f32 %v1976_v56 }
0x1139   : > { %v4180_v57 = vpop.eup %4179 }
0x113a   : > { %v1978_v58 = vadd.f32 1.0, %v4180_v57 }
0x113c   : > { %v1979_v59 = vmul.f32 0.5, %v1978_v58 }
0x113e   : > { %v1980_v60 = vmul.f32 %v1979_v59, %v1969_v49 }
0x1140   : > { %4010 = vmatmul.mubr.f32.vlgmr.msra.gmra.mxu1 %v1980_v60 }
0x1141   : > { %4050 = vmatprep.mubr.msk.f32.mxu1 %vm4214_vm2, %v4213_v1 }
0x1200   : > { %v2063_v61 = vpop.f32.mrf.mxu1 }
0x1201   : > { %v2067_v63 = vadd.f32 %v2063_v61, %v4605_v10  ;;  %v3716_v10 = vld [vmem:[%s4991_s6 + $0x28] sm:$0xff] }
0x1202   : > { %v4011_v0 = vpop.f32.mrf.mxu1  ;;  %4017 = vmatpush3.msra.mxu0 %v3716_v10  ;;  %v3723_v61 = vld [vmem:[%s4993_s8 + $0x28] sm:$0xff]  ;;  %v3727_v10 = vld [vmem:[%s4994_s9 + $0x1] ss:$0 sm:$0xff] }
0x1203   : > { %v4709_v2 = vadd.f32 %v3710_v62, %v2067_v63  ;;  %4018 = vmatprep.subr.mxu0 %v4213_v1  ;;  %4049 = vmatpush3.msra.mxu1 %v3723_v61  ;;  %v3751_v61 = vld [vmem:[%s4996_s11 + $0x1] ss:$0 sm:$0xff] }
0x1204   : > { %4019 = vmatpush3.msra.mxu0 %v3715_v11  ;;  %4058 = vmatprep.subr.mxu1 %v4213_v1 }
0x1205   : > { %v2080_v3 = vsel %vm768_vm1, %v4709_v2, 0.0  ;;  %4023 = vmatprep.subr.mxu0 %v4213_v1  ;;  %v2207_v11 = vadd.f32 %v3727_v10, %v4709_v2  ;;  %v3765_v10 = vld [vmem:[%s4999_s14 + $0xb0] sm:$0xff] }
0x1206   : > { %2081 = vadd.xlane.f32.xlu0 %v2080_v3 }
0x128f   : > { %v2082_v4 = vpop.xlane.xlu0 %2081 }
0x1290   : > { %v2083_v54 = vmul.f32 0.03125, %v2082_v4 }
0x1292   : > { %v2084_v5 = vsub.f32 %v4709_v2, %v2083_v54  ;;  %v3724_v2 = vld [vmem:[%s4993_s8 + $0x30] sm:$0xff] }
0x1294   : > { %v2085_v6 = vmul.f32 %v2084_v5, %v2084_v5 }
0x1296   : > { %v2086_v7 = vsel %vm768_vm1, %v2085_v6, 0.0 }
0x1297   : > { %2087 = vadd.xlane.f32.xlu0 %v2086_v7 }
0x1320   : > { %v2088_v12 = vpop.xlane.xlu0 %2087 }
0x1321   : > { %v2089_v13 = vmul.f32 0.03125, %v2088_v12 }
0x1323   : > { %v2090_v14 = vadd.f32 1e-06, %v2089_v13 }
0x1325   : > { %4181 = vrsqrt.f32 %v2090_v14 }
0x1332   : > { %v4182_v15 = vpop.eup %4181 }
0x1333   : > { %v2092_v17 = vmul.f32 %v4182_v15, %v2084_v5 }
0x1335   : > { %v2099_v19 = vmul.f32 %v3713_v16, %v2092_v17 }
0x1337   : > { %v2106_v20 = vadd.f32 %v3714_v18, %v2099_v19 }
0x1339   : > { %4021 = vmatmul.mubr.msk.f32.vlgmr.msra.gmra.mxu0 %vm808_vm3, %v2106_v20 }
0x133a   : > { %4025 = vmatprep.mubr.msk.f32.mxu0 %vm4214_vm2, %v4213_v1 }
0x13f9   : > { %v2189_v22 = vpop.f32.mrf.mxu0 }
0x13fa   : > { %v4743_v23 = vadd.f32 %v3720_v21, %v2189_v22 }
0x13fb   : > { %v4022_v24 = vpop.f32.mrf.mxu0 }
0x13fc   : > { %2209 = vrot.lane.b32.xlu0 %v4743_v23, %s4215_s30  ;;  %v4750_v25 = vmul.f32 0.35355338, %v4743_v23  ;;  %s5032_s30 = smov 64  }
0x1400   : > { %2450 = vrot.lane.b32.xlu0 %v4743_v23, %s4217_s22 }
0x1404   : > { %2448 = vrot.lane.b32.xlu0 %v4750_v25, %s5031_s24  ;;  %s5037_s24 = smov 104  }
0x146e   : > { %v2210_v26 = vpop.permute.xlu0 %2209 }
0x146f   : > { %4024 = vmatpush3.xpose.msk.msra.mxu0 %vm898_vm4, %v2210_v26 }
0x1470   : > { %4028 = vmatprep.subr.mxu0 %v4213_v1 }
0x1472   : > { %4026 = vmatmul.mubr.msk.f32.vlgmr.msra.gmra.mxu0 %vm898_vm4, %v4750_v25  ;;  %v2451_v41 = vpop.permute.xlu0 %2450 }
0x1473   : > { %4030 = vmatprep.mubr.msk.f32.mxu0 %vm4214_vm2, %v4213_v1 }
0x1476   : > { %v2449_v44 = vpop.permute.xlu0 %2448 }
0x1532   : > { %v2282_v27 = vpop.f32.mrf.mxu0 }
0x1533   : > { %v2286_v28 = vsel %vm974_vm5, %v2282_v27, -inf }
0x1534   : > { %2287 = vmax.xlane.f32.xlu1 %v2286_v28  ;;  %v4027_v29 = vpop.f32.mrf.mxu0 }
0x15bd   : > { %v2288_v30 = vpop.xlane.xlu1 %2287 }
0x15be   : > { %v2289_v31 = vsub.f32 %v2282_v27, %v2288_v30 }
0x15c0   : > { %v2290_v33 = vmul.f32 1.442695, %v2289_v31 }
0x15c2   : > { %4183 = vpow2.f32 %v2290_v33  ;;  %v3725_v33 = vld [vmem:[%s4993_s8 + $0x38] sm:$0xff] }
0x15cf   : > { %v4184_v34 = vpop.eup %4183 }
0x15d0   : > { %v2292_v35 = vsel %vm974_vm5, %v4184_v34, 0.0 }
0x15d1   : > { %2293 = vadd.xlane.f32.xlu1 %v2292_v35 }
0x15e2   : > { %2297 = vrot.lane.b32.xlu1 %v4743_v23, %s5032_s30  ;;  %s5038_s30 = smov 72  }
0x165a   : > { %v2294_v36 = vpop.xlane.xlu1 %2293 }
0x165b   : > { %4185 = vrcp.f32 %v2294_v36 }
0x165e   : > { %v2298_v37 = vpop.permute.xlu1 %2297 }
0x165f   : > { %4029 = vmatpush3.msk.msra.mxu0 %vm992_vm6, %v2298_v37 }
0x1660   : > { %4033 = vmatprep.subr.mxu0 %v4213_v1 }
0x1668   : > { %v4186_v38 = vpop.eup %4185 }
0x1669   : > { %v2296_v39 = vmul.f32 %v4186_v38, %v4184_v34 }
0x166b   : > { %4031 = vmatmul.mubr.msk.f32.vlgmr.msra.gmra.mxu0 %vm988_vm7, %v2296_v39 }
0x166c   : > { %4034 = vmatpush3.msra.mxu0 %v3722_v40  ;;  %4035 = vmatprep.mubr.msk.f32.mxu0 %vm4214_vm2, %v4213_v1 }
0x166d   : > { %4038 = vmatprep.subr.mxu0 %v4213_v1 }
0x172b   : > { %v2370_v42 = vpop.f32.mrf.mxu0 }
0x172c   : > { %4036 = vmatmul.mubr.msk.f32.vlgmr.msra.gmra.mxu0 %vm898_vm4, %v2370_v42 }
0x172d   : > { %4039 = vmatpush3.xpose.msk.msra.mxu0 %vm898_vm4, %v2451_v41  ;;  %v4032_v43 = vpop.f32.mrf.mxu0  ;;  %4040 = vmatprep.mubr.msk.f32.mxu0 %vm4214_vm2, %v4213_v1 }
0x172e   : > { %4043 = vmatprep.subr.mxu0 %v4213_v1 }
0x1730   : > { %4041 = vmatmul.mubr.msk.f32.vlgmr.msra.gmra.mxu0 %vm898_vm4, %v2449_v44 }
0x1731   : > { %4045 = vmatprep.mubr.msk.f32.mxu0 %vm4214_vm2, %v4213_v1 }
0x17ec   : > { %v2443_v45 = vpop.f32.mrf.mxu0 }
0x17ed   : > { %v2447_v12 = vadd.f32 %v2443_v45, %v2207_v11  ;;  %v3764_v11 = vld [vmem:[%s4999_s14 + $0xa8] sm:$0xff] }
0x17ee   : > { %v4037_v32 = vpop.f32.mrf.mxu0 }
0x17f0   : > { %v2522_v46 = vpop.f32.mrf.mxu0 }
0x17f1   : > { %v2526_v47 = vsel %vm974_vm5, %v2522_v46, -inf }
0x17f2   : > { %2527 = vmax.xlane.f32.xlu0 %v2526_v47  ;;  %v4042_v48 = vpop.f32.mrf.mxu0 }
0x1808   : > { %2537 = vrot.lane.b32.xlu0 %v4743_v23, %s5033_s28 }
0x180c   : > { %2688 = vrot.lane.b32.xlu0 %v4750_v25, %s5034_s1 }
0x187b   : > { %v2528_v49 = vpop.xlane.xlu0 %2527 }
0x187c   : > { %v2529_v50 = vsub.f32 %v2522_v46, %v2528_v49 }
0x187e   : > { %v2530_v51 = vmul.f32 1.442695, %v2529_v50  ;;  %v3755_v50 = vld [vmem:[%s4997_s12 + $0x38] sm:$0xff] }
0x187f   : > { %v2538_v52 = vpop.permute.xlu0 %2537 }
0x1880   : > { %4187 = vpow2.f32 %v2530_v51  ;;  %4044 = vmatpush3.msk.msra.mxu0 %vm992_vm6, %v2538_v52  ;;  %v3754_v51 = vld [vmem:[%s4997_s12 + $0x30] sm:$0xff]  ;;  %v3753_v52 = vld [vmem:[%s4997_s12 + $0x28] sm:$0xff] }
0x1881   : > { %4053 = vmatprep.subr.mxu0 %v4213_v1 }
0x1883   : > { %v2689_v60 = vpop.permute.xlu0 %2688 }
0x188d   : > { %v4188_v53 = vpop.eup %4187 }
0x188e   : > { %v2532_v55 = vsel %vm974_vm5, %v4188_v53, 0.0 }
0x188f   : > { %2533 = vadd.xlane.f32.xlu1 %v2532_v55 }
0x18a0   : > { %2690 = vrot.lane.b32.xlu1 %v4743_v23, %s5035_s4  ;;  %s5039_s4 = smov 40  }
0x1918   : > { %v2534_v56 = vpop.xlane.xlu1 %2533 }
0x1919   : > { %4189 = vrcp.f32 %v2534_v56 }
0x191c   : > { %v2691_v59 = vpop.permute.xlu1 %2690 }
0x1926   : > { %v4190_v57 = vpop.eup %4189 }
0x1927   : > { %v2536_v58 = vmul.f32 %v4190_v57, %v4188_v53  ;;  %v3752_v53 = vld [vmem:[%s4997_s12 + $0x20] sm:$0xff] }
0x1929   : > { %4046 = vmatmul.mubr.msk.f32.vlgmr.msra.gmra.mxu0 %vm988_vm7, %v2536_v58 }
0x192a   : > { %4054 = vmatpush3.xpose.msk.msra.mxu0 %vm898_vm4, %v2691_v59  ;;  %4055 = vmatprep.mubr.msk.f32.mxu0 %vm4214_vm2, %v4213_v1  ;;  %v3750_v59 = vld [vmem:[%s4995_s10 + $0x1] ss:$0 sm:$0xff] }
0x192b   : > { %4063 = vmatprep.subr.mxu0 %v4213_v1 }
0x192d   : > { %4056 = vmatmul.mubr.msk.f32.vlgmr.msra.gmra.mxu0 %vm898_vm4, %v2689_v60 }
0x192e   : > { %4065 = vmatprep.mubr.msk.f32.mxu0 %vm4214_vm2, %v4213_v1  ;;  %4064 = vmatpush3.msra.mxu0 %v3724_v2 }
0x192f   : > { %4073 = vmatprep.subr.mxu0 %v4213_v1 }
0x19e9   : > { %v2610_v62 = vpop.f32.mrf.mxu0 }
0x19ea   : > { %4051 = vmatmul.mubr.msk.f32.vlgmr.msra.gmra.mxu1 %vm898_vm4, %v2610_v62 }
0x19eb   : > { %v4047_v63 = vpop.f32.mrf.mxu0  ;;  %4060 = vmatprep.mubr.msk.f32.mxu1 %vm4214_vm2, %v4213_v1 }
0x19ed   : > { %v2762_v0 = vpop.f32.mrf.mxu0 }
0x19ee   : > { %v2766_v3 = vsel %vm974_vm5, %v2762_v0, -inf }
0x19ef   : > { %2767 = vmax.xlane.f32.xlu0 %v2766_v3  ;;  %v4057_v4 = vpop.f32.mrf.mxu0  ;;  %v3773_v3 = vld [vmem:[%s4999_s14 + $0xf0] sm:$0xff] }
0x19f0   : > { %v3772_v4 = vld [vmem:[%s4999_s14 + $0xe8] sm:$0xff] }
0x1a05   : > { %2777 = vrot.lane.b32.xlu0 %v4743_v23, %s5036_s23 }
0x1a09   : > { %2928 = vrot.lane.b32.xlu0 %v4750_v25, %s5037_s24 }
0x1a78   : > { %v2768_v54 = vpop.xlane.xlu0 %2767 }
0x1a79   : > { %v2769_v5 = vsub.f32 %v2762_v0, %v2768_v54  ;;  %v3774_v0 = vld [vmem:[%s4999_s14 + $0xf8] sm:$0xff]  ;;  %v3771_v54 = vld [vmem:[%s4999_s14 + $0xe0] sm:$0xff] }
0x1a7b   : > { %v2770_v6 = vmul.f32 1.442695, %v2769_v5  ;;  %v3770_v5 = vld [vmem:[%s4999_s14 + $0xd8] sm:$0xff] }
0x1a7c   : > { %v2778_v7 = vpop.permute.xlu0 %2777 }
0x1a7d   : > { %4191 = vpow2.f32 %v2770_v6  ;;  %4059 = vmatpush3.msk.msra.mxu1 %vm992_vm6, %v2778_v7  ;;  %v3769_v6 = vld [vmem:[%s4999_s14 + $0xd0] sm:$0xff]  ;;  %v3768_v7 = vld [vmem:[%s4999_s14 + $0xc8] sm:$0xff] }
0x1a7e   : > { %4068 = vmatprep.subr.mxu1 %v4213_v1 }
0x1a80   : > { %v2929_v20 = vpop.permute.xlu0 %2928 }
0x1a8a   : > { %v4192_v8 = vpop.eup %4191 }
0x1a8b   : > { %v2772_v9 = vsel %vm974_vm5, %v4192_v8, 0.0 }
0x1a8c   : > { %2773 = vadd.xlane.f32.xlu1 %v2772_v9  ;;  %v3766_v9 = vld [vmem:[%s4999_s14 + $0xb8] sm:$0xff] }
0x1a9d   : > { %2930 = vrot.lane.b32.xlu1 %v4743_v23, %s5038_s30  ;;  %s3789_s30 = sshll.u32 %s5041_s25, 5 }
0x1a9e   : > { %s656_s28 = scalar_lea.vmem %s5006_s21, %s3789_s30 }
0x1aaa   : > { %v2683_v13 = vpop.f32.mrf.mxu1 }
0x1aab   : > { %v2687_v14 = vadd.f32 %v2683_v13, %v2447_v12  ;;  %v3763_v12 = vld [vmem:[%s4999_s14 + $0xa0] sm:$0xff]  ;;  %v3762_v13 = vld [vmem:[%s4999_s14 + $0x98] sm:$0xff] }
0x1aac   : > { %v4052_v15 = vpop.f32.mrf.mxu1 }
0x1aad   : > { %v3760_v15 = vld [vmem:[%s4999_s14 + $0x88] sm:$0xff] }
0x1b15   : > { %v2774_v16 = vpop.xlane.xlu1 %2773 }
0x1b16   : > { %4193 = vrcp.f32 %v2774_v16  ;;  %v3759_v16 = vld [vmem:[%s4999_s14 + $0x80] sm:$0xff] }
0x1b19   : > { %v2931_v19 = vpop.permute.xlu1 %2930 }
0x1b23   : > { %v4194_v17 = vpop.eup %4193 }
0x1b24   : > { %v2776_v18 = vmul.f32 %v4194_v17, %v4192_v8  ;;  %v3767_v8 = vld [vmem:[%s4999_s14 + $0xc0] sm:$0xff] }
0x1b25   : > { %v3757_v17 = vld [vmem:[%s4998_s13 + $0x1] ss:$0 sm:$0xff] }
0x1b26   : > { %4061 = vmatmul.mubr.msk.f32.vlgmr.msra.gmra.mxu1 %vm988_vm7, %v2776_v18 }
0x1b27   : > { %4069 = vmatpush3.xpose.msk.msra.mxu1 %vm898_vm4, %v2931_v19  ;;  %4070 = vmatprep.mubr.msk.f32.mxu1 %vm4214_vm2, %v4213_v1 }
0x1b28   : > { %4078 = vmatprep.subr.mxu1 %v4213_v1 }
0x1b2a   : > { %4071 = vmatmul.mubr.msk.f32.vlgmr.msra.gmra.mxu1 %vm898_vm4, %v2929_v20 }
0x1b2b   : > { %4080 = vmatprep.mubr.msk.f32.mxu1 %vm4214_vm2, %v4213_v1  ;;  %4079 = vmatpush3.msra.mxu1 %v3725_v33 }
0x1b2c   : > { %4094 = vmatprep.subr.mxu1 %v4213_v1 }
0x1be6   : > { %v2850_v21 = vpop.f32.mrf.mxu1 }
0x1be7   : > { %4066 = vmatmul.mubr.msk.f32.vlgmr.msra.gmra.mxu0 %vm898_vm4, %v2850_v21 }
0x1be8   : > { %v4062_v22 = vpop.f32.mrf.mxu1  ;;  %4075 = vmatprep.mubr.msk.f32.mxu0 %vm4214_vm2, %v4213_v1 }
0x1bea   : > { %v3002_v24 = vpop.f32.mrf.mxu1 }
0x1beb   : > { %v3006_v25 = vsel %vm974_vm5, %v3002_v24, -inf }
0x1bec   : > { %3007 = vmax.xlane.f32.xlu1 %v3006_v25  ;;  %v4072_v26 = vpop.f32.mrf.mxu1 }
0x1c75   : > { %v3008_v27 = vpop.xlane.xlu1 %3007 }
0x1c76   : > { %v3009_v28 = vsub.f32 %v3002_v24, %v3008_v27 }
0x1c78   : > { %v3010_v29 = vmul.f32 1.442695, %v3009_v28 }
0x1c7a   : > { %4195 = vpow2.f32 %v3010_v29 }
0x1c87   : > { %v4196_v30 = vpop.eup %4195 }
0x1c88   : > { %v3012_v31 = vsel %vm974_vm5, %v4196_v30, 0.0 }
0x1c89   : > { %3013 = vadd.xlane.f32.xlu0 %v3012_v31  ;;  %v3776_v31 = vld [vmem:[%s5000_s15 + $0x1] ss:$0 sm:$0xff] }
0x1c9f   : > { %3017 = vrot.lane.b32.xlu0 %v4743_v23, %s5039_s4 }
0x1ca7   : > { %v2923_v34 = vpop.f32.mrf.mxu0 }
0x1ca8   : > { %v2927_v35 = vadd.f32 %v2923_v34, %v2687_v14  ;;  %v3761_v14 = vld [vmem:[%s4999_s14 + $0x90] sm:$0xff] }
0x1ca9   : > { %v4067_v36 = vpop.f32.mrf.mxu0 }
0x1d12   : > { %v3014_v37 = vpop.xlane.xlu0 %3013 }
0x1d13   : > { %4197 = vrcp.f32 %v3014_v37 }
0x1d16   : > { %v3018_v38 = vpop.permute.xlu0 %3017 }
0x1d17   : > { %4074 = vmatpush3.msk.msra.mxu0 %vm992_vm6, %v3018_v38 }
0x1d18   : > { %4083 = vmatprep.subr.mxu0 %v4213_v1 }
0x1d20   : > { %v4198_v39 = vpop.eup %4197 }
0x1d21   : > { %v3016_v40 = vmul.f32 %v4198_v39, %v4196_v30 }
0x1d23   : > { %4076 = vmatmul.mubr.msk.f32.vlgmr.msra.gmra.mxu0 %vm988_vm7, %v3016_v40 }
0x1d24   : > { %4091 = vmatprep.mubr.msk.f32.mxu0 %vm4214_vm2, %v4213_v1  ;;  %4084 = vmatpush3.msra.mxu0 %v3755_v50  ;;  %v3778_v50 = vld [vmem:[%s5002_s17] ss:$0 sm:$0xff] }
0x1d25   : > { %4085 = vmatprep.subr.mxu0 %v4213_v1 }
0x1d26   : > { %4086 = vmatpush3.msra.mxu0 %v3754_v51 }
0x1d27   : > { %4087 = vmatprep.subr.mxu0 %v4213_v1 }
0x1d28   : > { %4088 = vmatpush3.msra.mxu0 %v3753_v52 }
0x1d29   : > { %4089 = vmatprep.subr.mxu0 %v4213_v1 }
0x1d2a   : > { %4090 = vmatpush3.msra.mxu0 %v3752_v53 }
0x1de3   : > { %v3090_v23 = vpop.f32.mrf.mxu0 }
0x1de4   : > { %4081 = vmatmul.mubr.msk.f32.vlgmr.msra.gmra.mxu1 %vm898_vm4, %v3090_v23 }
0x1de5   : > { %v4077_v41 = vpop.f32.mrf.mxu0  ;;  %4126 = vmatprep.mubr.msk.f32.mxu1 %vm4214_vm2, %v4213_v1  ;;  %4095 = vmatpush3.msra.mxu1 %v3774_v0 }
0x1de6   : > { %4096 = vmatprep.subr.mxu1 %v4213_v1  ;;  %v3420_v41 = vld [vmem:[%s5003_s18] sm:$0xff] }
0x1de7   : > { %4097 = vmatpush3.msra.mxu1 %v3773_v3 }
0x1de8   : > { %4098 = vmatprep.subr.mxu1 %v4213_v1 }
0x1de9   : > { %4099 = vmatpush3.msra.mxu1 %v3772_v4 }
0x1dea   : > { %4100 = vmatprep.subr.mxu1 %v4213_v1 }
0x1deb   : > { %4101 = vmatpush3.msra.mxu1 %v3771_v54 }
0x1dec   : > { %4102 = vmatprep.subr.mxu1 %v4213_v1 }
0x1ded   : > { %4103 = vmatpush3.msra.mxu1 %v3770_v5 }
0x1dee   : > { %4104 = vmatprep.subr.mxu1 %v4213_v1 }
0x1def   : > { %4105 = vmatpush3.msra.mxu1 %v3769_v6 }
0x1df0   : > { %4106 = vmatprep.subr.mxu1 %v4213_v1 }
0x1df1   : > { %4107 = vmatpush3.msra.mxu1 %v3768_v7 }
0x1df2   : > { %4108 = vmatprep.subr.mxu1 %v4213_v1 }
0x1df3   : > { %4109 = vmatpush3.msra.mxu1 %v3767_v8 }
0x1df4   : > { %4110 = vmatprep.subr.mxu1 %v4213_v1 }
0x1df5   : > { %4111 = vmatpush3.msra.mxu1 %v3766_v9 }
0x1df6   : > { %4112 = vmatprep.subr.mxu1 %v4213_v1 }
0x1df7   : > { %4113 = vmatpush3.msra.mxu1 %v3765_v10 }
0x1df8   : > { %4114 = vmatprep.subr.mxu1 %v4213_v1 }
0x1df9   : > { %4115 = vmatpush3.msra.mxu1 %v3764_v11 }
0x1dfa   : > { %4116 = vmatprep.subr.mxu1 %v4213_v1 }
0x1dfb   : > { %4117 = vmatpush3.msra.mxu1 %v3763_v12 }
0x1dfc   : > { %4118 = vmatprep.subr.mxu1 %v4213_v1 }
0x1dfd   : > { %4119 = vmatpush3.msra.mxu1 %v3762_v13 }
0x1dfe   : > { %4120 = vmatprep.subr.mxu1 %v4213_v1 }
0x1dff   : > { %4121 = vmatpush3.msra.mxu1 %v3761_v14 }
0x1e00   : > { %4122 = vmatprep.subr.mxu1 %v4213_v1 }
0x1e01   : > { %4123 = vmatpush3.msra.mxu1 %v3760_v15 }
0x1e02   : > { %4124 = vmatprep.subr.mxu1 %v4213_v1 }
0x1e03   : > { %4125 = vmatpush3.msra.mxu1 %v3759_v16 }
0x1ea4   : > { %v3163_v42 = vpop.f32.mrf.mxu1 }
0x1ea5   : > { %v4851_v43 = vadd.f32 %v3163_v42, %v2927_v35  ;;  %v3423_v42 = vld [vmem:[%s5004_s19 + $0x8] sm:$0xff] }
0x1ea6   : > { %v4082_v44 = vpop.f32.mrf.mxu1 }
0x1ea7   : > { %v3172_v45 = vsel %vm768_vm1, %v4851_v43, 0.0  ;;  %v4226_v44 = vmov 0  }
0x1ea8   : > { %3173 = vadd.xlane.f32.xlu1 %v3172_v45  ;;  %4157 = vset.pattern.permute.xlu0 %v4226_v44 }
0x1ea9   : > { %4156 = vset.pattern.permute.xlu1 %v4226_v44  ;;  %3431 = vperm.xlu0 %4157, %v3423_v42  }
0x1f31   : > { %v3174_v32 = vpop.xlane.xlu1 %3173 }
0x1f32   : > { %v3175_v46 = vmul.f32 0.03125, %v3174_v32 }
0x1f34   : > { %v3176_v47 = vsub.f32 %v4851_v43, %v3175_v46 }
0x1f36   : > { %v3177_v48 = vmul.f32 %v3176_v47, %v3176_v47 }
0x1f38   : > { %v3178_v49 = vsel %vm768_vm1, %v3177_v48, 0.0  ;;  %v3777_v48 = vld [vmem:[%s5001_s16] ss:$0 sm:$0xff] }
0x1f39   : > { %3179 = vadd.xlane.f32.xlu1 %v3178_v49 }
0x1fc2   : > { %v3180_v55 = vpop.xlane.xlu1 %3179 }
0x1fc3   : > { %v3181_v56 = vmul.f32 0.03125, %v3180_v55  ;;  %v3421_v55 = vld [vmem:[%s5003_s18 + $0x8] sm:$0xff] }
0x1fc5   : > { %v3182_v57 = vadd.f32 1e-06, %v3181_v56  ;;  %v3519_v56 = vld [vmem:[%s5005_s20] sm:$0xff] }
0x1fc7   : > { %4199 = vrsqrt.f32 %v3182_v57  ;;  %v3521_v57 = vcombine.high %v3519_v56, %v3519_v56 }
0x1fd4   : > { %v4200_v58 = vpop.eup %4199 }
0x1fd5   : > { %v3184_v60 = vmul.f32 %v4200_v58, %v3176_v47 }
0x1fd7   : > { %v3191_v62 = vmul.f32 %v3750_v59, %v3184_v60 }
0x1fd9   : > { %v3198_v63 = vadd.f32 %v3751_v61, %v3191_v62  ;;  %v3432_v62 = vpop.permute.xlu0 %3431 }
0x1fdb   : > { %4092 = vmatmul.mubr.msk.f32.vlgmr.msra.gmra.mxu0 %vm808_vm3, %v3198_v63 }
0x1fdc   : > { %4131 = vmatprep.mubr.msk.f32.mxu0 %vm808_vm3, %v3420_v41 }
0x209b   : > { %v3281_v18 = vpop.f32.mrf.mxu0 }
0x209c   : > { %v3282_v19 = vadd.f32 %v3757_v17, %v3281_v18 }
0x209d   : > { %v4093_v20 = vpop.f32.mrf.mxu0 }
0x209e   : > { %v3285_v2 = vmul.f32 %v3282_v19, %v3282_v19 }
0x20a0   : > { %v3286_v21 = vmul.f32 %v3285_v2, %v3282_v19 }
0x20a2   : > { %v3287_v22 = vmul.f32 0.044715, %v3286_v21 }
0x20a4   : > { %v3288_v24 = vadd.f32 %v3287_v22, %v3282_v19 }
0x20a6   : > { %v3289_v25 = vmul.f32 0.7978846, %v3288_v24 }
0x20a8   : > { %4201 = vtanh.f32 %v3289_v25 }
0x20b5   : > { %v4202_v26 = vpop.eup %4201 }
0x20b6   : > { %v3291_v27 = vadd.f32 1.0, %v4202_v26 }
0x20b8   : > { %v3292_v28 = vmul.f32 0.5, %v3291_v27 }
0x20ba   : > { %v3293_v29 = vmul.f32 %v3292_v28, %v3282_v19 }
0x20bc   : > { %4127 = vmatmul.mubr.f32.vlgmr.msra.gmra.mxu1 %v3293_v29 }
0x217c   : > { %v3377_v30 = vpop.f32.mrf.mxu1 }
0x217d   : > { %v3381_v33 = vadd.f32 %v3377_v30, %v4851_v43  ;;  %v3422_v43 = vld [vmem:[%s5004_s19] sm:$0xff] }
0x217e   : > { %v4128_v34 = vpop.f32.mrf.mxu1 }
0x217f   : > { %v3390_v35 = vadd.f32 %v3776_v31, %v3381_v33 }
0x2181   : > { %v3393_v36 = vsel %vm768_vm1, %v3390_v35, 0.0 }
0x2182   : > { %3394 = vadd.xlane.f32.xlu1 %v3393_v36 }
0x220b   : > { %v3395_v37 = vpop.xlane.xlu1 %3394 }
0x220c   : > { %v3396_v38 = vmul.f32 0.03125, %v3395_v37 }
0x220e   : > { %v3397_v39 = vsub.f32 %v3390_v35, %v3396_v38 }
0x2210   : > { %v3398_v40 = vmul.f32 %v3397_v39, %v3397_v39 }
0x2212   : > { %v3399_v23 = vsel %vm768_vm1, %v3398_v40, 0.0 }
0x2213   : > { %3400 = vadd.xlane.f32.xlu1 %v3399_v23 }
0x2224   : > { %3426 = vperm.xlu1 %4156, %v3422_v43  }
0x229c   : > { %v3401_v45 = vpop.xlane.xlu1 %3400 }
0x229d   : > { %v3402_v32 = vmul.f32 0.03125, %v3401_v45 }
0x229f   : > { %v3403_v46 = vadd.f32 1e-06, %v3402_v32 }
0x22a0   : > { %v3427_v59 = vpop.permute.xlu1 %3426 }
0x22a1   : > { %4203 = vrsqrt.f32 %v3403_v46 }
0x22ae   : > { %v4204_v47 = vpop.eup %4203 }
0x22af   : > { %v3405_v49 = vmul.f32 %v4204_v47, %v3397_v39 }
0x22b1   : > { %v3412_v51 = vmul.f32 %v3777_v48, %v3405_v49 }
0x22b3   : > { %v3419_v52 = vadd.f32 %v3778_v50, %v3412_v51 }
0x22b5   : > { %v3435_v53 = vrot.slane %v3419_v52, 1 }
0x22b7   : > { %4129 = vmatprep.subr.msk.mxu0 %vm808_vm3, %v3435_v53 }
0x22b8   : > { %4130 = vmatpush3.xpose.msk.msra.mxu0 %vm808_vm3, %v3435_v53 }
0x22b9   : > { %3782 = vmatprep.subr.msk.mxu0 %vm3529_vm8, %v3521_v57 }
0x22bb   : > { %4132 = vmatmul.mubr.msk.f32.vlgmr.msra.gmra.mxu0 %vm808_vm3, %v3421_v55 }
0x22bc   : > { %3598 = vmatprep.mubr.f32.mxu0 %v4213_v1  ;;  %3783 = vmatpush1.msk.msra.mxu0 %vm3529_vm8, %v3519_v56 }
0x237b   : > { %v4133_v58 = vpop.f32.mrf.mxu0 }
0x237c   : > { %v3516_v63 = vadd.f32 %v4133_v58, %v3432_v62 }
0x237d   : > { %v3510_v60 = vpop.f32.mrf.mxu0 }
0x237e   : > { %v3511_v61 = vadd.f32 %v3510_v60, %v3427_v59 }
0x2380   : > { %3784 = vmatmul.mubr.msk.f32.vlgmr.msra.gmra.mxu0 %vm3522_vm9, %v3511_v61 }
0x2381   : > { %3604 = vmatprep.mubr.f32.mxu0 %v4213_v1 }
0x2384   : > { %3785 = vmatmul.mubr.msk.f32.gmra.mxu0 %vm3522_vm9, %v3516_v63 }
0x2440   : > { %v3600_v0 = vpop.f32.mrf.mxu0 }
0x2441   : > { %3611 = vst [vmem:[%s656_s28] sm:$0xff] %v3600_v0 }
0x2442   : > { %v3602_v3 = vpop.f32.mrf.mxu0 }
0x2443   : > { %3612 = vst [vmem:[%s656_s28 + $0x8] sm:$0xff] %v3602_v3 }
0x2444   : > { %v3606_v4 = vpop.f32.mrf.mxu0 }
0x2445   : > { %3613 = vst [vmem:[%s656_s28 + $0x10] sm:$0xff] %v3606_v4 }
0x2446   : > { %v3608_v54 = vpop.f32.mrf.mxu0 }
0x2447   : > { %3614 = vst [vmem:[%s656_s28 + $0x18] sm:$0xff] %v3608_v54 }
0x2448 PF: > { %s31_s2 = sadd.s32 1, %s4211_s2  }
0x2449   : > { %p28_p4 = scmp.ge.s32.totalorder %s31_s2, 4  }
0x244b   :  { %30 = sbr.rel (!%p28_p4) target bundleno = 7 (0x7), region = 146 }

</bundles_post_ra>
